<compile_context>
chip_gen: v6e
topology: v6e:2x2x1
jax: 0.10.0
libtpu: 0.0.40
codegen_flags: <defaults>
</compile_context>

<pallas_src>
import functools

import jax
import jax.numpy as jnp
from jax.experimental import pallas as pl
from jax.experimental.pallas import tpu as pltpu


def getxtnet_kernel(x_ref, w1_ref, b1_ref, w23_ref, b23_ref,
                    feat_ref, hid_ref, code_ref, *, alpha):
    # x arrives in its stored dtype (f32); cast to bf16 in-kernel for the MXU.
    x = x_ref[...].astype(jnp.bfloat16)

    # fc1 + ReLU  -> feat (returned).  f32 accumulation, f32 epilogue (VPU).
    feat = jnp.dot(x, w1_ref[...], preferred_element_type=jnp.float32) + b1_ref[...]
    feat = jnp.maximum(feat, 0.0)
    feat_ref[...] = feat.astype(feat_ref.dtype)

    # Folded fc2*fc3 (512 -> txt_feat_len): single matmul with precomputed
    # W23 = W2^T @ W3^T and b23 = b2 @ W3^T + b3.
    hid = jnp.dot(feat.astype(jnp.bfloat16), w23_ref[...],
                  preferred_element_type=jnp.float32) + b23_ref[...]
    hid_ref[...] = hid.astype(hid_ref.dtype)

    # code = tanh(alpha * hid)   (tanh on the EUP, f32)
    code_ref[...] = jnp.tanh(alpha * hid).astype(code_ref.dtype)


def prepare_params(params):
    """One-time prep (call ONCE, not per forward):
      * transpose PyTorch-style (out,in) weights to (in,out), cast to bf16,
      * fold fc2 and fc3 into a single matmul: W23 = W2^T @ W3^T, b23 = b2 @ W3^T + b3,
      * pad the output feature dim up to a multiple of 128 (lane-dense stores)."""
    w1, b1, w2, b2, w3, b3 = params
    hp = jax.lax.Precision.HIGHEST
    T = w3.shape[0]
    Tp = ((T + 127) // 128) * 128

    w23 = jnp.dot(w2.T.astype(jnp.float32), w3.T.astype(jnp.float32),
                  precision=hp)                                   # (512, T)
    b23 = jnp.dot(b2.astype(jnp.float32), w3.T.astype(jnp.float32),
                  precision=hp) + b3.astype(jnp.float32)          # (T,)
    if Tp != T:
        w23 = jnp.pad(w23, ((0, 0), (0, Tp - T)))
        b23 = jnp.pad(b23, ((0, Tp - T),))

    return dict(
        w1t=jnp.asarray(w1.T, jnp.bfloat16),                      # (code_len, 512)
        b1=b1.reshape(1, -1).astype(jnp.float32),                 # (1, 512)
        w23t=w23.astype(jnp.bfloat16),                            # (512, Tp)
        b23=b23.reshape(1, -1).astype(jnp.float32),               # (1, Tp)
        t=T,
    )


def getxtnet_forward(x, prepared, *, alpha=1.0, tb=512,
                     feat_dtype=jnp.bfloat16, hid_dtype=jnp.float32,
                     code_dtype=jnp.bfloat16):
    """GeTxtNet forward. Returns (feat, hid, code) like the module.
    NOTE: alpha is baked into the compiled kernel; set_alpha(epoch) implies one
    recompile per distinct alpha value (once per epoch -> negligible)."""
    w1t, b1, w23t, b23, T = (prepared["w1t"], prepared["b1"],
                             prepared["w23t"], prepared["b23"], prepared["t"])
    B, C = x.shape
    H = w1t.shape[1]           # 512 hidden
    Tp = w23t.shape[1]         # txt_feat_len padded to multiple of 128

    tb = min(tb, B)
    nb = pl.cdiv(B, tb)
    Bp = nb * tb
    xin = x
    if Bp != B:
        # TODO(synk): for ragged production batches pick a tb dividing B (or
        # mask in-kernel); this pad + trailing slice adds extra HBM passes.
        xin = jnp.pad(x, ((0, Bp - B), (0, 0)))

    kernel = functools.partial(getxtnet_kernel, alpha=float(alpha))

    # Grid-invariant operands: constant index_map + single buffer (no point
    # double-buffering something whose block index never changes).
    def const_spec(shape):
        return pl.BlockSpec(shape, lambda i: (0, 0), pipeline_mode=pl.Buffered(1))

    feat, hid, code = pl.pallas_call(
        kernel,
        out_shape=(
            jax.ShapeDtypeStruct((Bp, H), feat_dtype),    # feat (bf16 by default)
            jax.ShapeDtypeStruct((Bp, Tp), hid_dtype),    # hid  (f32)
            jax.ShapeDtypeStruct((Bp, Tp), code_dtype),   # code (bf16 by default)
        ),
        grid_spec=pltpu.PrefetchScalarGridSpec(
            num_scalar_prefetch=0,
            grid=(nb,),
            in_specs=[
                pl.BlockSpec((tb, C), lambda i: (i, 0)),   # x tile over batch
                const_spec((C, H)),                        # W1^T  (bf16, resident)
                const_spec((1, H)),                        # b1
                const_spec((H, Tp)),                       # W23^T (folded fc2*fc3)
                const_spec((1, Tp)),                       # b23
            ],
            out_specs=[
                pl.BlockSpec((tb, H), lambda i: (i, 0)),
                pl.BlockSpec((tb, Tp), lambda i: (i, 0)),
                pl.BlockSpec((tb, Tp), lambda i: (i, 0)),
            ],
        ),
        compiler_params=pltpu.CompilerParams(
            dimension_semantics=("parallel",),             # batch tiles -> both TCs (v7x)
            vmem_limit_bytes=32 * 1024 * 1024,             # ~3-16 MiB used even at tb=1024
        ),
    )(xin, w1t, b1, w23t, b23)

    if Bp != B:
        feat, hid, code = feat[:B], hid[:B], code[:B]
    if Tp != T:
        hid, code = hid[:, :T], code[:, :T]
    return feat, hid, code


def init_params(key, code_len, txt_feat_len, hidden=512):
    """Deterministic synthetic init (PyTorch-Linear-style shapes: (out, in))."""
    ks = jax.random.split(key, 6)
    s1 = 1.0 / jnp.sqrt(code_len)
    s2 = 1.0 / jnp.sqrt(hidden)
    w1 = jax.random.uniform(ks[0], (hidden, code_len), jnp.float32, -s1, s1)
    b1 = jax.random.uniform(ks[1], (hidden,), jnp.float32, -s1, s1)
    w2 = jax.random.uniform(ks[2], (hidden, hidden), jnp.float32, -s2, s2)
    b2 = jax.random.uniform(ks[3], (hidden,), jnp.float32, -s2, s2)
    w3 = jax.random.uniform(ks[4], (txt_feat_len, hidden), jnp.float32, -s2, s2)
    b3 = jax.random.uniform(ks[5], (txt_feat_len,), jnp.float32, -s2, s2)
    return (w1, b1, w2, b2, w3, b3)


if __name__ == "__main__":
    # Small demo shapes consistent with the module (hidden hardwired to 512).
    # B = 2 * TB so the "parallel" grid axis has >= 2 steps (v7x megacore);
    # on real workloads raise TB to 256-1024 while keeping nb >= 2.
    B, CODE_LEN, TXT_FEAT_LEN, ALPHA = 256, 128, 256, 1.0
    TB = 128

    key = jax.random.PRNGKey(0)
    kx, kp = jax.random.split(key)
    x = jax.random.normal(kx, (B, CODE_LEN), jnp.float32)
    params = init_params(kp, CODE_LEN, TXT_FEAT_LEN)

    prepared = prepare_params(params)   # one-time transpose + fold + bf16 cast
    feat, hid, code = getxtnet_forward(x, prepared, alpha=ALPHA, tb=TB)
    jax.block_until_ready((feat, hid, code))

    # Pure-JAX reference mirroring the kernel numerics (bf16-rounded inputs /
    # weights, fc2*fc3 folded in f32 then bf16, f32 accumulation), so only MXU
    # summation order and bf16 output rounding differ -> modest tolerance.
    w1, b1, w2, b2, w3, b3 = params
    hp = jax.lax.Precision.HIGHEST
    rnd = lambda a: a.astype(jnp.bfloat16).astype(jnp.float32)
    f_ref = jnp.maximum(jnp.dot(rnd(x), rnd(w1).T, precision=hp) + b1, 0.0)
    w23_ref = rnd(jnp.dot(w2.T, w3.T, precision=hp))
    b23_ref = jnp.dot(b2, w3.T, precision=hp) + b3
    h_ref = jnp.dot(rnd(f_ref), w23_ref, precision=hp) + b23_ref
    c_ref = jnp.tanh(ALPHA * h_ref)

    assert feat.shape == (B, 512)
    assert hid.shape == (B, TXT_FEAT_LEN) and code.shape == (B, TXT_FEAT_LEN)
    # feat/code are emitted in bf16 -> tolerance absorbs the output rounding.
    assert jnp.allclose(feat.astype(jnp.float32), f_ref, atol=1e-2, rtol=1e-2)
    assert jnp.allclose(hid, h_ref, atol=5e-3, rtol=5e-3)
    assert jnp.allclose(code.astype(jnp.float32), c_ref, atol=1e-2, rtol=1e-2)

    print("KERNEL_OK")
</pallas_src>

<mosaic_0001>
module attributes {stable_mosaic.version = 11 : i64} {
  func.func @getxtnet_kernel(%arg0: i32, %arg1: memref<128x128xf32, #tpu.memory_space<vmem>>, %arg2: memref<128x512xbf16, #tpu.memory_space<vmem>>, %arg3: memref<1x512xf32, #tpu.memory_space<vmem>>, %arg4: memref<512x256xbf16, #tpu.memory_space<vmem>>, %arg5: memref<1x256xf32, #tpu.memory_space<vmem>>, %arg6: memref<128x512xbf16, #tpu.memory_space<vmem>>, %arg7: memref<128x256xf32, #tpu.memory_space<vmem>>, %arg8: memref<128x256xbf16, #tpu.memory_space<vmem>>) attributes {dimension_semantics = [#tpu.dimension_semantics<parallel>], iteration_bounds = array<i64: 2>, scalar_prefetch = 0 : i64, scratch_operands = 0 : i64, tpu.core_type = #tpu.core_type<tc>, window_params = [{transform_indices = @transform_0, window_bounds = array<i64: 128, 128>}, {pipeline_mode = #tpu.pipeline_mode<synchronous>, transform_indices = @transform_1, window_bounds = array<i64: 128, 512>}, {pipeline_mode = #tpu.pipeline_mode<synchronous>, transform_indices = @transform_2, window_bounds = array<i64: 1, 512>}, {pipeline_mode = #tpu.pipeline_mode<synchronous>, transform_indices = @transform_3, window_bounds = array<i64: 512, 256>}, {pipeline_mode = #tpu.pipeline_mode<synchronous>, transform_indices = @transform_4, window_bounds = array<i64: 1, 256>}, {transform_indices = @transform_5, window_bounds = array<i64: 128, 512>}, {transform_indices = @transform_6, window_bounds = array<i64: 128, 256>}, {transform_indices = @transform_7, window_bounds = array<i64: 128, 256>}]} {
    %c0 = arith.constant 0 : index
    %c0_0 = arith.constant 0 : index
    %0 = vector.load %arg1[%c0, %c0_0] : memref<128x128xf32, #tpu.memory_space<vmem>>, vector<128x128xf32>
    %1 = arith.truncf %0 : vector<128x128xf32> to vector<128x128xbf16>
    %c0_1 = arith.constant 0 : index
    %c0_2 = arith.constant 0 : index
    %2 = vector.load %arg2[%c0_1, %c0_2] : memref<128x512xbf16, #tpu.memory_space<vmem>>, vector<128x512xbf16>
    %cst = arith.constant dense<0.000000e+00> : vector<128x512xf32>
    %3 = tpu.matmul %1, %2, %cst {dimension_numbers = #tpu.dot_dimension_numbers<[1], [0], [0], [1], [0, 0, 1, 1], [], []>} : vector<128x128xbf16>, vector<128x512xbf16>, vector<128x512xf32> -> vector<128x512xf32>
    %c0_3 = arith.constant 0 : index
    %c0_4 = arith.constant 0 : index
    %4 = vector.load %arg3[%c0_3, %c0_4] : memref<1x512xf32, #tpu.memory_space<vmem>>, vector<1x512xf32>
    %5 = vector.broadcast %4 : vector<1x512xf32> to vector<128x512xf32>
    %6 = arith.addf %3, %5 : vector<128x512xf32>
    %cst_5 = arith.constant 0.000000e+00 : f32
    %7 = vector.broadcast %cst_5 : f32 to vector<128x512xf32>
    %8 = arith.maximumf %6, %7 : vector<128x512xf32>
    %9 = arith.truncf %8 : vector<128x512xf32> to vector<128x512xbf16>
    %c0_6 = arith.constant 0 : index
    %c0_7 = arith.constant 0 : index
    %10 = vector.load %arg6[%c0_6, %c0_7] : memref<128x512xbf16, #tpu.memory_space<vmem>>, vector<128x512xbf16>
    tpu.vector_store %arg6[%c0_6, %c0_7], %9 {strides = array<i32>} : memref<128x512xbf16, #tpu.memory_space<vmem>>, vector<128x512xbf16>,
    %11 = arith.truncf %8 : vector<128x512xf32> to vector<128x512xbf16>
    %c0_8 = arith.constant 0 : index
    %c0_9 = arith.constant 0 : index
    %12 = vector.load %arg4[%c0_8, %c0_9] : memref<512x256xbf16, #tpu.memory_space<vmem>>, vector<512x256xbf16>
    %cst_10 = arith.constant dense<0.000000e+00> : vector<128x256xf32>
    %13 = tpu.matmul %11, %12, %cst_10 {dimension_numbers = #tpu.dot_dimension_numbers<[1], [0], [0], [1], [0, 0, 1, 1], [], []>} : vector<128x512xbf16>, vector<512x256xbf16>, vector<128x256xf32> -> vector<128x256xf32>
    %c0_11 = arith.constant 0 : index
    %c0_12 = arith.constant 0 : index
    %14 = vector.load %arg5[%c0_11, %c0_12] : memref<1x256xf32, #tpu.memory_space<vmem>>, vector<1x256xf32>
    %15 = vector.broadcast %14 : vector<1x256xf32> to vector<128x256xf32>
    %16 = arith.addf %13, %15 : vector<128x256xf32>
    %c0_13 = arith.constant 0 : index
    %c0_14 = arith.constant 0 : index
    %17 = vector.load %arg7[%c0_13, %c0_14] : memref<128x256xf32, #tpu.memory_space<vmem>>, vector<128x256xf32>
    tpu.vector_store %arg7[%c0_13, %c0_14], %16 {strides = array<i32>} : memref<128x256xf32, #tpu.memory_space<vmem>>, vector<128x256xf32>,
    %cst_15 = arith.constant 1.000000e+00 : f32
    %18 = vector.broadcast %cst_15 : f32 to vector<128x256xf32>
    %19 = arith.mulf %18, %16 : vector<128x256xf32>
    %20 = math.tanh %19 : vector<128x256xf32>
    %21 = arith.truncf %20 : vector<128x256xf32> to vector<128x256xbf16>
    %c0_16 = arith.constant 0 : index
    %c0_17 = arith.constant 0 : index
    %22 = vector.load %arg8[%c0_16, %c0_17] : memref<128x256xbf16, #tpu.memory_space<vmem>>, vector<128x256xbf16>
    tpu.vector_store %arg8[%c0_16, %c0_17], %21 {strides = array<i32>} : memref<128x256xbf16, #tpu.memory_space<vmem>>, vector<128x256xbf16>,
    return
  }
  func.func @transform_0(%arg0: i32) -> (i32, i32) {
    %c0_i32 = arith.constant 0 : i32
    %c0_i32_0 = arith.constant 0 : i32
    return %arg0, %c0_i32 : i32, i32
  }
  func.func @transform_1(%arg0: i32) -> (i32, i32) {
    %c0_i32 = arith.constant 0 : i32
    %c0_i32_0 = arith.constant 0 : i32
    %c0_i32_1 = arith.constant 0 : i32
    return %c0_i32, %c0_i32_0 : i32, i32
  }
  func.func @transform_2(%arg0: i32) -> (i32, i32) {
    %c0_i32 = arith.constant 0 : i32
    %c0_i32_0 = arith.constant 0 : i32
    %c0_i32_1 = arith.constant 0 : i32
    return %c0_i32, %c0_i32_0 : i32, i32
  }
  func.func @transform_3(%arg0: i32) -> (i32, i32) {
    %c0_i32 = arith.constant 0 : i32
    %c0_i32_0 = arith.constant 0 : i32
    %c0_i32_1 = arith.constant 0 : i32
    return %c0_i32, %c0_i32_0 : i32, i32
  }
  func.func @transform_4(%arg0: i32) -> (i32, i32) {
    %c0_i32 = arith.constant 0 : i32
    %c0_i32_0 = arith.constant 0 : i32
    %c0_i32_1 = arith.constant 0 : i32
    return %c0_i32, %c0_i32_0 : i32, i32
  }
  func.func @transform_5(%arg0: i32) -> (i32, i32) {
    %c0_i32 = arith.constant 0 : i32
    %c0_i32_0 = arith.constant 0 : i32
    return %arg0, %c0_i32 : i32, i32
  }
  func.func @transform_6(%arg0: i32) -> (i32, i32) {
    %c0_i32 = arith.constant 0 : i32
    %c0_i32_0 = arith.constant 0 : i32
    return %arg0, %c0_i32 : i32, i32
  }
  func.func @transform_7(%arg0: i32) -> (i32, i32) {
    %c0_i32 = arith.constant 0 : i32
    %c0_i32_0 = arith.constant 0 : i32
    return %arg0, %c0_i32 : i32, i32
  }
}

</mosaic_0001>

<bundles_post_ra>
// kernel: tpu_custom_call.1
= control target key start
LH: loop header
LB: loop body
LE: loop exit
PB: predicated region body
PF: predicated region fallthrough
CT: control target
= control target key end

     0   :  { %s3497_s0 = inlined_call_operand.hbm [shape: f32[256,128], index: 0, kind: input, shape index: {}]   ;;  %s3498_s1 = inlined_call_operand.hbm [shape: bf16[128,512], index: 1, kind: input, shape index: {}]   ;;  %s3499_s2 = inlined_call_operand.hbm [shape: f32[1,512], index: 2, kind: input, shape index: {}]   ;;  %s3500_s3 = inlined_call_operand.hbm [shape: bf16[512,256], index: 3, kind: input, shape index: {}]   ;;  %s3501_s4 = inlined_call_operand.vmem [shape: f32[1,256], index: 4, kind: input, shape index: {}]   ;;  %s3502_s5 = inlined_call_operand.hbm [shape: bf16[256,512], index: 5, kind: output, shape index: {0}]   ;;  %s3503_s6 = inlined_call_operand.hbm [shape: f32[256,256], index: 6, kind: output, shape index: {1}]   ;;  %s3504_s7 = inlined_call_operand.hbm [shape: bf16[256,256], index: 7, kind: output, shape index: {2}]  }
   0x1   :  { %3513 = sst [smem:[#allocation19_spill]] %s3498_s1 }
   0x2   :  { %13 = vsyncpa [#allocation3], 0 }
   0x3   :  { %15 = vsyncpa [#allocation3 + $0x1], 0 }
   0x4   :  { %16 = vsyncpa [#allocation6], 0 }
   0x5   :  { %17 = vsyncpa [#allocation9], 0 }
   0x6   :  { %18 = vsyncpa [#allocation4], 0 }
   0x7   :  { %20 = vsyncpa [#allocation4 + $0x1], 0 }
   0x8   :  { %21 = vsyncpa [#allocation12], 0 }
   0x9   :  { %23 = vsyncpa [#allocation12 + $0x1], 0  ;;  %s2960_s24 = smov 0   ;;  %s2962_s25 = smov 0  }
   0xa   :  { %s2964_s26 = smov 0   ;;  %s2966_s27 = smov 0  }
   0xb LB: > { %s2981_s28 = sadd.s32 4294967295, %s2902_s27   ;;  %s3507_s29 = sadd.s32 4294967294, %s2902_s27   ;;  %s2902_s27 = sphi %s2966_s27, %s3538_s27   ;;  %s2898_s26 = sphi %s2964_s26, %s3537_s26   ;;  %s2894_s25 = sphi %s2962_s25, %s3536_s25   ;;  %s2890_s24 = sphi %s2960_s24, %s3535_s24  }
   0xc   : > { %p49_p0 = scmp.ne.s32.totalorder %s2894_s25, %s2890_s24  ;;  %p3505_p1 = scmp.eq.s32.totalorder %s2981_s28, 0 }
   0xd   : > { %p163_p3 = scmp.eq.s32.totalorder %s3507_s29, 1  ;;  %p2135_p5 = scmp.ge.s32.totalorder %s2902_s27, 1 }
   0xe   : > { %p2992_p4 = por %p3505_p1, %p49_p0  ;;  %p222_p7 = scmp.lt.s32.totalorder %s2902_s27, 3 }
   0xf   : > { %p2997_p6 = por %p163_p3, %p49_p0  ;;  %s2904_s10 = smov [#allocation5]  }
  0x10   : > { %s3514_s30 = scalar_select %p2992_p4, 1, 0 }
  0x11   : > { %s3515_s8 = scalar_select %p2997_p6, 1, 0 }
  0x12   : > { %p3002_p8 = pnand %p2135_p5, %p222_p7  ;;  %s234_s11 = sshll.u32 %s2904_s10, 4  ;;  %s235_s11 = int_to_ptr.vmem [resolvable:$true] %s234_s11 }
  0x13   : > { %s2905_s13 = smov [#allocation7]   ;;  %s2906_s15 = smov [#allocation8]  }
  0x14   : > { %s3516_s9 = scalar_select %p3002_p8, 1, 0 }
  0x15   : > { %p2384_p9 = pneg %p3002_p8  ;;  %s248_s14 = sshll.u32 %s2905_s13, 4  ;;  %s249_s14 = int_to_ptr.vmem [resolvable:$true] %s248_s14 }
  0x16   : > { %s258_s16 = sshll.u32 %s2906_s15, 4  ;;  %s2679_s17 = scalar_lea.vmem %s235_s11, 4096  ;;  %s259_s16 = int_to_ptr.vmem [resolvable:$true] %s258_s16 }
  0x17   : > { %p3011_p11 = pnand %p2384_p9, %p3505_p1  ;;  %p2680_p13 = scmp.ne.s32.totalorder %s235_s11, %s2679_s17 }
  0x18   : > { %p2687_p5 = scmp.lt.s32.totalorder %s235_s11, %s235_s11  ;;  %p2688_p7 = scmp.lt.s32.totalorder %s2679_s17, %s2679_s17 }
  0x19   : > { %p2670_p12 = pneg %p3011_p11 }
  0x1a   : > { %p2689_p9 = por %p2688_p7, %p2687_p5 }
  0x1b   : > { %p2682_p0 = pnand %p2680_p13, %p2670_p12 }
  0x1d   : > { %p2683_p3 = pneg %p2682_p0 }
  0x1f   : > { %p2690_p10 = pnand %p2689_p9, %p2683_p3 }
  0x21   : > { %2693 = shalt.err (!%p2690_p10)
}
  0x22   : > { %s2907_s18 = smov 256   ;;  %s2908_s19 = smov 16  }
  0x23   : > { %s3518_s1 = sld [smem:[#allocation19_spill]]  ;;  %s2705_s22 = scalar_lea.vmem %s249_s14, 64 }
  0x24   : > { %p2706_p1 = scmp.ne.s32.totalorder %s249_s14, %s2705_s22  ;;  %p2713_p2 = scmp.lt.s32.totalorder %s249_s14, %s249_s14 }
  0x25   : > { %p2714_p6 = scmp.lt.s32.totalorder %s2705_s22, %s2705_s22 }
  0x26   : > { %p2708_p13 = pnand %p2706_p1, %p2670_p12 }
  0x27   : > { %p2715_p5 = por %p2714_p6, %p2713_p2 }
  0x28   : > { %p2709_p0 = pneg %p2708_p13 }
  0x29   : > { %2387 = dma.hbm_to_vmem [thread:$0]  (!%p3011_p11), %s3518_s1, 4096, %s235_s11, [#allocation6], %s2907_s18, %s2907_s18, %s2908_s19  }
  0x2a   : > { %p2716_p3 = pnand %p2715_p5, %p2709_p0 }
  0x2c   : > { %2719 = shalt.err (!%p2716_p3)
}
  0x2d   : > { %2390 = dma.hbm_to_vmem [thread:$0]  (!%p3011_p11), %s3499_s2, 64, %s249_s14, [#allocation6]  }
  0x2e   : > { %s2731_s11 = scalar_lea.vmem %s259_s16, 8192  ;;  %p2739_p9 = scmp.lt.s32.totalorder %s259_s16, %s259_s16 }
  0x2f   : > { %p2732_p10 = scmp.ne.s32.totalorder %s259_s16, %s2731_s11  ;;  %p2740_p13 = scmp.lt.s32.totalorder %s2731_s11, %s2731_s11 }
  0x31   : > { %p2734_p7 = pnand %p2732_p10, %p2670_p12  ;;  %p2741_p4 = por %p2740_p13, %p2739_p9 }
  0x33   : > { %p2735_p1 = pneg %p2734_p7 }
  0x35   : > { %p2742_p2 = pnand %p2741_p4, %p2735_p1 }
  0x37   : > { %2745 = shalt.err (!%p2742_p2)
}
  0x38   : > { %s3508_s13 = smov 128   ;;  %s3509_s14 = smov 8  }
  0x39   : > { %2393 = dma.hbm_to_vmem [thread:$0]  (!%p3011_p11), %s3500_s3, 8192, %s259_s16, [#allocation9], %s3508_s13, %s3508_s13, %s3509_s14  }
  0x3a   : > { %s3045_s18 = sadd.s32 1, %s2902_s27   ;;  %s36_s20 = sadd.s32 1, %s2898_s26 }
  0x3b   : > { %s33_s19 = ssub.s32 %s2902_s27, %s3045_s18  ;;  %p43_p6 = scmp.ne.s32.totalorder %s2898_s26, %s2894_s25 }
  0x3c   : > { %p34_p4 = scmp.eq.s32.totalorder %s33_s19, 0  ;;  %p44_p12 = scmp.eq.s32.totalorder %s2902_s27, 0 }
  0x3d   : > { %p2411_p0 = scmp.lt.s32.totalorder %s2902_s27, 2  ;;  %p3519_p3 = scmp.eq.s32.totalorder %s2981_s28, 1 }
  0x3e   : > { %s3055_s21 = scalar_select %p34_p4, %s2898_s26, %s36_s20  }
  0x3f   : > { %p45_p5 = por %p44_p12, %p43_p6  ;;  %p3059_p10 = por %p3519_p3, %p43_p6 }
  0x40   : > { %s275_s22 = sand.u32 1, %s2898_s26   ;;  %s2309_s23 = sshll.u32 %s2902_s27, 11 }
  0x41   : > { %s3520_s12 = scalar_select %p3059_p10, 1, 0 }
  0x42   : > { %s2140_s16 = sshll.u32 %s275_s22, 7  ;;  %s3068_s15 = scalar_lea.hbm %s3497_s0, %s2309_s23 }
  0x43   : > { %s279_s17 = scalar_lea.vmem [#allocation2], %s2140_s16  ;;  %p3070_p11 = pnand %p2411_p0, %p45_p5 }
  0x44   : > { %s286_s19 = sshll.u32 %s279_s17, 4  ;;  %s3076_s29 = scalar_lea.sflag [#allocation3], %s275_s22  ;;  %s3074_s19 = int_to_ptr.vmem [resolvable:$true] %s286_s19 }
  0x45   : > { %s2746_s13 = scalar_lea.hbm %s3068_s15, 2048  ;;  %p2748_p1 = pneg %p3070_p11 }
  0x46   : > { %p2747_p7 = scmp.ne.s32.totalorder %s3068_s15, %s2746_s13  ;;  %s2751_s16 = scalar_lea.hbm %s3497_s0, 4096 }
  0x47   : > { %p2752_p2 = scmp.lt.s32.totalorder %s3068_s15, %s3497_s0  ;;  %p2753_p4 = scmp.lt.s32.totalorder %s2751_s16, %s2746_s13 }
  0x48   : > { %p2749_p9 = pnand %p2748_p1, %p2747_p7 }
  0x49   : > { %p2754_p6 = por %p2753_p4, %p2752_p2 }
  0x4a   : > { %p2750_p13 = pneg %p2749_p9 }
  0x4c   : > { %p2755_p12 = pnand %p2754_p6, %p2750_p13 }
  0x4e   : > { %2758 = shalt.err (!%p2755_p12)
}
  0x4f   : > { %s2759_s22 = scalar_lea.vmem %s3074_s19, 2048  ;;  %s2911_s14 = smov [#allocation2]  }
  0x50   : > { %p2760_p0 = scmp.ne.s32.totalorder %s3074_s19, %s2759_s22  ;;  %s2764_s1 = sshll.u32 %s2911_s14, 4  ;;  %s2765_s1 = int_to_ptr.vmem [resolvable:$false] %s2764_s1 }
  0x51   : > { %s2766_s23 = scalar_lea.vmem %s2765_s1, 4096  ;;  %p2767_p7 = scmp.lt.s32.totalorder %s3074_s19, %s2765_s1 }
  0x52   : > { %p2762_p5 = pnand %p2760_p0, %p2748_p1  ;;  %p2768_p9 = scmp.lt.s32.totalorder %s2766_s23, %s2759_s22 }
  0x54   : > { %p2763_p3 = pneg %p2762_p5  ;;  %p2769_p10 = por %p2768_p9, %p2767_p7 }
  0x56   : > { %p2770_p8 = pnand %p2769_p10, %p2763_p3 }
  0x58   : > { %2773 = shalt.err (!%p2770_p8)
}
  0x59   : > { %s3522_s13 = smov 8   ;;  %s3523_s10 = smov 128  }
  0x5a   : > { %2397 = dma.hbm_to_vmem [thread:$0]  (!%p3070_p11), %s3068_s15, 2048, %s3074_s19, %s3076_s29, %s3523_s10, %s3523_s10, %s3522_s13  }
  0x5b   : > { %p3524_p1 = scmp.ne.s32.totalorder %s3516_s9, 0 }
  0x5c   : > { %s3103_s14 = sand.u32 (!%p3524_p1), 1, %s2894_s25   ;;  %p3525_p8 = scmp.ne.s32.totalorder (!%p3524_p1), %s3514_s30, 0 }
  0x5d   : > { %298 = sbr.rel (%p3524_p1) target bundleno = 643 (0x283), region = 40  ;;  %s2144_s1 = sshll.u32 (!%p3524_p1), %s3103_s14, 7 }
  0x5e   : > { %s301_s16 = scalar_lea.sflag (!%p3524_p1), [#allocation3], %s3103_s14  ;;  %s3109_s20 = scalar_lea.vmem (!%p3524_p1), [#allocation2], %s2144_s1 }
  0x62   : > { %2869 = dma.done.wait (%p3525_p8), %s301_s16, 2048  }
  0x63   : > { %2871 = vsyncadd (%p3525_p8), %s301_s16, 4294965248  ;;  %p3526_p10 = scmp.eq.s32.totalorder %s2981_s28, 0 }
  0x65   : > { %2873 = dma.done.wait (%p3526_p10), [#allocation6], 4160   ;;  %p3527_p11 = pmov %p3526_p10 }
  0x66   : > { %p3528_p13 = pmov %p3526_p10 }
  0x67   : > { %2875 = vsyncadd (%p3527_p11), [#allocation6], 4294963136 }
  0x68   : > { %2877 = dma.done.wait (%p3528_p13), [#allocation9], 8192   ;;  %p3529_p2 = pmov %p3526_p10 }
  0x69   : > { %v2912_v0 = vmov 0   ;;  %v2460_v1 = vld [vmem:[#allocation5 + $0xe4] ss:$16 sps:$4 sm:$0xff]   ;;  %v2462_v2 = vld [vmem:[#allocation5 + $0xec] ss:$16 sps:$4 sm:$0xff]   ;;  %s2148_s29 = sshll.u32 %s3103_s14, 8 }
  0x6a   : > { %2879 = vsyncadd (%p3529_p2), [#allocation9], 4294959104  ;;  %632 = vmatprep.mubr.bf16.mxu0 %v2912_v0  ;;  %745 = vmatprep.mubr.bf16.mxu1 %v2912_v0  ;;  %v2464_v3 = vld [vmem:[#allocation5 + $0xe0] ss:$16 sps:$4 sm:$0xff]   ;;  %v2465_v4 = vld [vmem:[#allocation5 + $0xe8] ss:$16 sps:$4 sm:$0xff]  }
  0x6b   : > { %600 = vmatprep.subr.bf16.mxu0 %v2460_v1  ;;  %713 = vmatprep.subr.bf16.mxu1 %v2462_v2  ;;  %v2466_v5 = vld [vmem:[#allocation5 + $0xc4] ss:$16 sps:$4 sm:$0xff]   ;;  %v2468_v6 = vld [vmem:[#allocation5 + $0xcc] ss:$16 sps:$4 sm:$0xff]   ;;  %v2470_v7 = vld [vmem:[#allocation5 + $0xc0] ss:$16 sps:$4 sm:$0xff]  }
  0x6c   : > { %601 = vmatpush1.bf16.msra.mxu0 %v2464_v3  ;;  %714 = vmatpush1.bf16.msra.mxu1 %v2465_v4  ;;  %v2471_v8 = vld [vmem:[#allocation5 + $0xc8] ss:$16 sps:$4 sm:$0xff]   ;;  %v2472_v9 = vld [vmem:[#allocation5 + $0xa4] ss:$16 sps:$4 sm:$0xff]   ;;  %v2474_v10 = vld [vmem:[#allocation5 + $0xac] ss:$16 sps:$4 sm:$0xff]  }
  0x6d   : > { %602 = vmatprep.subr.bf16.mxu0 %v2466_v5  ;;  %715 = vmatprep.subr.bf16.mxu1 %v2468_v6  ;;  %v2476_v11 = vld [vmem:[#allocation5 + $0xa0] ss:$16 sps:$4 sm:$0xff]   ;;  %v2477_v12 = vld [vmem:[#allocation5 + $0xa8] ss:$16 sps:$4 sm:$0xff]   ;;  %v2478_v13 = vld [vmem:[#allocation5 + $0x84] ss:$16 sps:$4 sm:$0xff]  }
  0x6e   : > { %v2480_v14 = vld [vmem:[#allocation5 + $0x8c] ss:$16 sps:$4 sm:$0xff]   ;;  %v2482_v15 = vld [vmem:[#allocation5 + $0x80] ss:$16 sps:$4 sm:$0xff]   ;;  %v2483_v16 = vld [vmem:[#allocation5 + $0x88] ss:$16 sps:$4 sm:$0xff]  }
  0x6f   : > { %v2484_v17 = vld [vmem:[#allocation5 + $0x64] ss:$16 sps:$4 sm:$0xff]   ;;  %v2486_v18 = vld [vmem:[#allocation5 + $0x6c] ss:$16 sps:$4 sm:$0xff]   ;;  %v2488_v19 = vld [vmem:[#allocation5 + $0x60] ss:$16 sps:$4 sm:$0xff]  }
  0x70   : > { %603 = vmatpush1.bf16.msra.mxu0 %v2470_v7  ;;  %716 = vmatpush1.bf16.msra.mxu1 %v2471_v8  ;;  %v2489_v20 = vld [vmem:[#allocation5 + $0x68] ss:$16 sps:$4 sm:$0xff]   ;;  %v2490_v21 = vld [vmem:[#allocation5 + $0x44] ss:$16 sps:$4 sm:$0xff]   ;;  %v2492_v22 = vld [vmem:[#allocation5 + $0x4c] ss:$16 sps:$4 sm:$0xff]  }
  0x71   : > { %604 = vmatprep.subr.bf16.mxu0 %v2472_v9  ;;  %717 = vmatprep.subr.bf16.mxu1 %v2474_v10  ;;  %v2494_v23 = vld [vmem:[#allocation5 + $0x40] ss:$16 sps:$4 sm:$0xff]   ;;  %v2495_v24 = vld [vmem:[#allocation5 + $0x48] ss:$16 sps:$4 sm:$0xff]   ;;  %v2496_v25 = vld [vmem:[#allocation5 + $0x24] ss:$16 sps:$4 sm:$0xff]  }
  0x72   : > { %v2498_v26 = vld [vmem:[#allocation5 + $0x2c] ss:$16 sps:$4 sm:$0xff]   ;;  %v2500_v27 = vld [vmem:[#allocation5 + $0x20] ss:$16 sps:$4 sm:$0xff]   ;;  %v2501_v28 = vld [vmem:[#allocation5 + $0x28] ss:$16 sps:$4 sm:$0xff]  }
  0x73   : > { %v2502_v29 = vld [vmem:[#allocation5 + $0x4] ss:$16 sps:$4 sm:$0xff]   ;;  %v2504_v30 = vld [vmem:[#allocation5 + $0xc] ss:$16 sps:$4 sm:$0xff]   ;;  %v2506_v31 = vld [vmem:[#allocation5] ss:$16 sps:$4 sm:$0xff]  }
  0x74   : > { %605 = vmatpush1.bf16.msra.mxu0 %v2476_v11  ;;  %718 = vmatpush1.bf16.msra.mxu1 %v2477_v12  ;;  %v2507_v32 = vld [vmem:[#allocation5 + $0x8] ss:$16 sps:$4 sm:$0xff]   ;;  %v362_v33 = vld [vmem:[%s3109_s20] sm:$0xff]  ;;  %v2508_v38 = vld [vmem:[#allocation8 + $0x70] ss:$8 sps:$4 sm:$0xff]   ;;  %s3184_s30 = scalar_lea.vmem [#allocation10], %s2148_s29 }
  0x75   : > { %606 = vmatprep.subr.bf16.mxu0 %v2478_v13  ;;  %719 = vmatprep.subr.bf16.mxu1 %v2480_v14  ;;  %v363_v34 = vld [vmem:[%s3109_s20 + $0x8] sm:$0xff]  ;;  %v2510_v35 = vld [vmem:[#allocation8 + $0x74] ss:$8 sps:$4 sm:$0xff]   ;;  %v2511_v39 = vld [vmem:[#allocation8 + $0x170] ss:$8 sps:$4 sm:$0xff]   ;;  %s3512_s9 = sshll.u32 %s2981_s28, 12 }
  0x76   : > { %v2513_v36 = vld [vmem:[#allocation8 + $0x174] ss:$8 sps:$4 sm:$0xff]   ;;  %v378_v37 = vpack.c.bf16 %v363_v34, %v362_v33  ;;  %v2516_v40 = vld [vmem:[#allocation8 + $0x64] ss:$8 sps:$4 sm:$0xff]   ;;  %v2514_v44 = vld [vmem:[#allocation8 + $0x60] ss:$8 sps:$4 sm:$0xff]   ;;  %s3280_s11 = scalar_lea.hbm %s3502_s5, %s3512_s9 }
  0x77   : > { %v2519_v41 = vld [vmem:[#allocation8 + $0x164] ss:$8 sps:$4 sm:$0xff]   ;;  %v365_v43 = vld [vmem:[%s3109_s20 + $0x18] sm:$0xff]  ;;  %v2517_v45 = vld [vmem:[#allocation8 + $0x160] ss:$8 sps:$4 sm:$0xff]   ;;  %s1937_s17 = sshll.u32 %s3184_s30, 4  ;;  %s3283_s17 = int_to_ptr.vmem [resolvable:$true] %s1937_s17 }
  0x78   : > { %607 = vmatpush1.bf16.msra.mxu0 %v2482_v15  ;;  %720 = vmatpush1.bf16.msra.mxu1 %v2483_v16  ;;  %v364_v42 = vld [vmem:[%s3109_s20 + $0x10] sm:$0xff]  ;;  %v2522_v46 = vld [vmem:[#allocation8 + $0x54] ss:$8 sps:$4 sm:$0xff]   ;;  %v367_v54 = vld [vmem:[%s3109_s20 + $0x28] sm:$0xff]  ;;  %s1913_s22 = scalar_lea.sflag [#allocation4], %s3103_s14  ;;  %s2774_s23 = scalar_lea.vmem %s3283_s17, 4096 }
  0x79   : > { %608 = vmatprep.subr.bf16.mxu0 %v2484_v17  ;;  %721 = vmatprep.subr.bf16.mxu1 %v2486_v18  ;;  %v2525_v47 = vld [vmem:[#allocation8 + $0x154] ss:$8 sps:$4 sm:$0xff]   ;;  %v379_v48 = vpack.c.bf16 %v365_v43, %v364_v42  ;;  %v2520_v49 = vld [vmem:[#allocation8 + $0x50] ss:$8 sps:$4 sm:$0xff]   ;;  %v2528_v51 = vld [vmem:[#allocation8 + $0x44] ss:$8 sps:$4 sm:$0xff]   ;;  %p2775_p4 = scmp.ne.s32.totalorder %s3283_s17, %s2774_s23 }
  0x7a   : > { %v2523_v50 = vld [vmem:[#allocation8 + $0x150] ss:$8 sps:$4 sm:$0xff]   ;;  %v2531_v52 = vld [vmem:[#allocation8 + $0x144] ss:$8 sps:$4 sm:$0xff]   ;;  %v366_v53 = vld [vmem:[%s3109_s20 + $0x20] sm:$0xff]  ;;  %p3530_p6 = scmp.ne.s32.totalorder %s3520_s12, 0 }
  0x7b   : > { %v2526_v55 = vld [vmem:[#allocation8 + $0x40] ss:$8 sps:$4 sm:$0xff]   ;;  %v2534_v57 = vld [vmem:[#allocation8 + $0x34] ss:$8 sps:$4 sm:$0xff]   ;;  %v380_v59 = vpack.c.bf16 %v367_v54, %v366_v53  ;;  %v2532_v60 = vld [vmem:[#allocation8 + $0x30] ss:$8 sps:$4 sm:$0xff]  }
  0x7c   : > { %609 = vmatpush1.bf16.msra.mxu0 %v2488_v19  ;;  %722 = vmatpush1.bf16.msra.mxu1 %v2489_v20  ;;  %v2529_v56 = vld [vmem:[#allocation8 + $0x140] ss:$8 sps:$4 sm:$0xff]   ;;  %v2537_v58 = vld [vmem:[#allocation8 + $0x134] ss:$8 sps:$4 sm:$0xff]   ;;  %v2535_v61 = vld [vmem:[#allocation8 + $0x130] ss:$8 sps:$4 sm:$0xff]   ;;  %p2776_p12 = pnand %p2775_p4, %p3530_p6 }
  0x7d   : > { %610 = vmatprep.subr.bf16.mxu0 %v2490_v21  ;;  %723 = vmatprep.subr.bf16.mxu1 %v2492_v22  ;;  %v2540_v62 = vld [vmem:[#allocation8 + $0x24] ss:$8 sps:$4 sm:$0xff]   ;;  %v369_v2 = vld [vmem:[%s3109_s20 + $0x38] sm:$0xff]  ;;  %v2538_v3 = vld [vmem:[#allocation8 + $0x20] ss:$8 sps:$4 sm:$0xff]   ;;  %s2913_s13 = smov [#allocation10]  }
  0x7e   : > { %v2543_v63 = vld [vmem:[#allocation8 + $0x124] ss:$8 sps:$4 sm:$0xff]   ;;  %v2541_v4 = vld [vmem:[#allocation8 + $0x120] ss:$8 sps:$4 sm:$0xff]   ;;  %v2546_v5 = vld [vmem:[#allocation8 + $0x14] ss:$8 sps:$4 sm:$0xff]   ;;  %p2777_p0 = pneg %p2776_p12 }
  0x7f   : > { %v368_v1 = vld [vmem:[%s3109_s20 + $0x30] sm:$0xff]  ;;  %v2549_v6 = vld [vmem:[#allocation8 + $0x114] ss:$8 sps:$4 sm:$0xff]   ;;  %v371_v13 = vld [vmem:[%s3109_s20 + $0x48] sm:$0xff]  ;;  %s2778_s10 = sshll.u32 %s2913_s13, 4  ;;  %s2779_s10 = int_to_ptr.vmem [resolvable:$false] %s2778_s10 }
  0x80   : > { %611 = vmatpush1.bf16.msra.mxu0 %v2494_v23  ;;  %724 = vmatpush1.bf16.msra.mxu1 %v2495_v24  ;;  %v381_v7 = vpack.c.bf16 %v369_v2, %v368_v1  ;;  %v2544_v8 = vld [vmem:[#allocation8 + $0x10] ss:$8 sps:$4 sm:$0xff]   ;;  %v370_v10 = vld [vmem:[%s3109_s20 + $0x40] sm:$0xff]  ;;  %v2552_v11 = vld [vmem:[#allocation8 + $0x4] ss:$8 sps:$4 sm:$0xff]   ;;  %s2780_s16 = scalar_lea.vmem %s2779_s10, 8192  ;;  %p2781_p5 = scmp.lt.s32.totalorder %s3283_s17, %s2779_s10 }
  0x81   : > { %612 = vmatprep.subr.bf16.mxu0 %v2496_v25  ;;  %725 = vmatprep.subr.bf16.mxu1 %v2498_v26  ;;  %v2547_v9 = vld [vmem:[#allocation8 + $0x110] ss:$8 sps:$4 sm:$0xff]   ;;  %v2555_v12 = vld [vmem:[#allocation8 + $0x104] ss:$8 sps:$4 sm:$0xff]   ;;  %v2550_v14 = vld [vmem:[#allocation8] ss:$8 sps:$4 sm:$0xff]   ;;  %v382_v18 = vpack.c.bf16 %v371_v13, %v370_v10  ;;  %p2782_p3 = scmp.lt.s32.totalorder %s2780_s16, %s2774_s23 }
  0x82   : > { %v2553_v15 = vld [vmem:[#allocation8 + $0x100] ss:$8 sps:$4 sm:$0xff]   ;;  %v2558_v16 = vld [vmem:[#allocation8 + $0xf4] ss:$8 sps:$4 sm:$0xff]   ;;  %v2556_v19 = vld [vmem:[#allocation8 + $0xf0] ss:$8 sps:$4 sm:$0xff]  }
  0x83   : > { %v2561_v17 = vld [vmem:[#allocation8 + $0x1f4] ss:$8 sps:$4 sm:$0xff]   ;;  %v2559_v20 = vld [vmem:[#allocation8 + $0x1f0] ss:$8 sps:$4 sm:$0xff]   ;;  %v2564_v21 = vld [vmem:[#allocation8 + $0xe4] ss:$8 sps:$4 sm:$0xff]   ;;  %p2783_p7 = por %p2782_p3, %p2781_p5 }
  0x84   : > { %613 = vmatpush1.bf16.msra.mxu0 %v2500_v27  ;;  %726 = vmatpush1.bf16.msra.mxu1 %v2501_v28  ;;  %v2567_v22 = vld [vmem:[#allocation8 + $0x1e4] ss:$8 sps:$4 sm:$0xff]   ;;  %v373_v24 = vld [vmem:[%s3109_s20 + $0x58] sm:$0xff]  ;;  %v2562_v25 = vld [vmem:[#allocation8 + $0xe0] ss:$8 sps:$4 sm:$0xff]  }
  0x85   : > { %614 = vmatprep.subr.bf16.mxu0 %v2502_v29  ;;  %727 = vmatprep.subr.bf16.mxu1 %v2504_v30  ;;  %v372_v23 = vld [vmem:[%s3109_s20 + $0x50] sm:$0xff]  ;;  %v2565_v26 = vld [vmem:[#allocation8 + $0x1e0] ss:$8 sps:$4 sm:$0xff]   ;;  %v2570_v27 = vld [vmem:[#allocation8 + $0xd4] ss:$8 sps:$4 sm:$0xff]   ;;  %p2784_p9 = pnand %p2783_p7, %p2777_p0 }
  0x86   : > { %v2573_v28 = vld [vmem:[#allocation8 + $0x1d4] ss:$8 sps:$4 sm:$0xff]   ;;  %v383_v29 = vpack.c.bf16 %v373_v24, %v372_v23  ;;  %v2568_v30 = vld [vmem:[#allocation8 + $0xd0] ss:$8 sps:$4 sm:$0xff]   ;;  %v2579_v33 = vld [vmem:[#allocation8 + $0x1c4] ss:$8 sps:$4 sm:$0xff]  }
  0x87   : > { %v374_v34 = vld [vmem:[%s3109_s20 + $0x60] sm:$0xff]  ;;  %v2583_v42 = vld [vmem:[#allocation8 + $0x1b0] ss:$8 sps:$4 sm:$0xff]   ;;  %v2600_v53 = vld [vmem:[#allocation8 + $0x84] ss:$8 sps:$4 sm:$0xff]  }
  0x88   : > { %615 = vmatpush1.bf16.msra.mxu0 %v2506_v31  ;;  %728 = vmatpush1.bf16.msra.mxu1 %v2507_v32  ;;  %v2571_v31 = vld [vmem:[#allocation8 + $0x1d0] ss:$8 sps:$4 sm:$0xff]   ;;  %v2576_v32 = vld [vmem:[#allocation8 + $0xc4] ss:$8 sps:$4 sm:$0xff]  }
  0x89   : > { %1510 = vmatprep.subr.bf16.mxu0 %v2510_v35  ;;  %1623 = vmatprep.subr.bf16.mxu1 %v2513_v36  ;;  %v375_v35 = vld [vmem:[%s3109_s20 + $0x68] sm:$0xff]  ;;  %v376_v43 = vld [vmem:[%s3109_s20 + $0x70] sm:$0xff] }
  0x8a   : > { %v2574_v36 = vld [vmem:[#allocation8 + $0xc0] ss:$8 sps:$4 sm:$0xff]   ;;  %v2603_v54 = vld [vmem:[#allocation8 + $0x184] ss:$8 sps:$4 sm:$0xff]  }
  0x8b   : > { %633 = vmatmul.mubr.bf16.vlgmr.msra.gmra.mxu0 %v378_v37  ;;  %746 = vmatmul.mubr.bf16.vlgmr.msra.gmra.mxu1 %v378_v37  ;;  %v2577_v37 = vld [vmem:[#allocation8 + $0x1c0] ss:$8 sps:$4 sm:$0xff]  }
  0x8c   : > { %642 = vmatprep.mubr.bf16.mxu0 %v2912_v0  ;;  %755 = vmatprep.mubr.bf16.mxu1 %v2912_v0 }
  0x8d   : > { %1511 = vmatpush1.bf16.msra.mxu0 %v2508_v38  ;;  %1624 = vmatpush1.bf16.msra.mxu1 %v2511_v39  ;;  %v2582_v38 = vld [vmem:[#allocation8 + $0xb4] ss:$8 sps:$4 sm:$0xff]  }
  0x8e   : > { %1512 = vmatprep.subr.bf16.mxu0 %v2516_v40  ;;  %1625 = vmatprep.subr.bf16.mxu1 %v2519_v41  ;;  %v2585_v39 = vld [vmem:[#allocation8 + $0x1b4] ss:$8 sps:$4 sm:$0xff]   ;;  %v384_v40 = vpack.c.bf16 %v375_v35, %v374_v34  ;;  %v2580_v41 = vld [vmem:[#allocation8 + $0xb0] ss:$8 sps:$4 sm:$0xff]  }
  0x91   : > { %1513 = vmatpush1.bf16.msra.mxu0 %v2514_v44  ;;  %1626 = vmatpush1.bf16.msra.mxu1 %v2517_v45  ;;  %v377_v44 = vld [vmem:[%s3109_s20 + $0x78] sm:$0xff] }
  0x92   : > { %1514 = vmatprep.subr.bf16.mxu0 %v2522_v46  ;;  %1627 = vmatprep.subr.bf16.mxu1 %v2525_v47  ;;  %v385_v45 = vpack.c.bf16 %v377_v44, %v376_v43  ;;  %v2588_v46 = vld [vmem:[#allocation8 + $0xa4] ss:$8 sps:$4 sm:$0xff]  }
  0x93   : > { %643 = vmatmul.mubr.bf16.gmra.mxu0 %v379_v48  ;;  %756 = vmatmul.mubr.bf16.gmra.mxu1 %v379_v48  ;;  %v2591_v47 = vld [vmem:[#allocation8 + $0x1a4] ss:$8 sps:$4 sm:$0xff]   ;;  %v2586_v48 = vld [vmem:[#allocation8 + $0xa0] ss:$8 sps:$4 sm:$0xff]  }
  0x94   : > { %652 = vmatprep.mubr.bf16.mxu0 %v2912_v0  ;;  %765 = vmatprep.mubr.bf16.mxu1 %v2912_v0 }
  0x95   : > { %1515 = vmatpush1.bf16.msra.mxu0 %v2520_v49  ;;  %1628 = vmatpush1.bf16.msra.mxu1 %v2523_v50  ;;  %v2589_v49 = vld [vmem:[#allocation8 + $0x1a0] ss:$8 sps:$4 sm:$0xff]   ;;  %v2594_v50 = vld [vmem:[#allocation8 + $0x94] ss:$8 sps:$4 sm:$0xff]  }
  0x96   : > { %1516 = vmatprep.subr.bf16.mxu0 %v2528_v51  ;;  %1629 = vmatprep.subr.bf16.mxu1 %v2531_v52  ;;  %v2592_v51 = vld [vmem:[#allocation8 + $0x90] ss:$8 sps:$4 sm:$0xff]   ;;  %v2597_v52 = vld [vmem:[#allocation8 + $0x194] ss:$8 sps:$4 sm:$0xff]  }
  0x99   : > { %1517 = vmatpush1.bf16.msra.mxu0 %v2526_v55  ;;  %1630 = vmatpush1.bf16.msra.mxu1 %v2529_v56  ;;  %v2598_v55 = vld [vmem:[#allocation8 + $0x80] ss:$8 sps:$4 sm:$0xff]  }
  0x9a   : > { %1518 = vmatprep.subr.bf16.mxu0 %v2534_v57  ;;  %1631 = vmatprep.subr.bf16.mxu1 %v2537_v58  ;;  %v2601_v56 = vld [vmem:[#allocation8 + $0x180] ss:$8 sps:$4 sm:$0xff]   ;;  %v420_v57 = vlaneseq }
  0x9b   : > { %653 = vmatmul.mubr.bf16.gmra.mxu0 %v380_v59  ;;  %766 = vmatmul.mubr.bf16.gmra.mxu1 %v380_v59 }
  0x9c   : > { %662 = vmatprep.mubr.bf16.mxu0 %v2912_v0  ;;  %775 = vmatprep.mubr.bf16.mxu1 %v2912_v0  ;;  %v3155_v58 = vshrl.u32 %v420_v57, 7 }
  0x9d   : > { %1519 = vmatpush1.bf16.msra.mxu0 %v2532_v60  ;;  %1632 = vmatpush1.bf16.msra.mxu1 %v2535_v61  ;;  %v418_v61 = vld [vmem:[#allocation7] sm:$0xf] }
  0x9e   : > { %1520 = vmatprep.subr.bf16.mxu0 %v2540_v62  ;;  %1633 = vmatprep.subr.bf16.mxu1 %v2543_v63  ;;  %v422_v59 = vsub.s32 0, %v3155_v58  ;;  %v430_v60 = vsub.s32 2, %v3155_v58  ;;  %v426_v62 = vsub.s32 1, %v3155_v58  ;;  %v434_v63 = vsub.s32 3, %v3155_v58 }
  0xa0   : > { %v3163_v1 = vrot.slane %v418_v61, %v422_v59  ;;  %v3165_v2 = vrot.slane %v418_v61, %v430_v60 }
  0xa1   : > { %1521 = vmatpush1.bf16.msra.mxu0 %v2538_v3  ;;  %1634 = vmatpush1.bf16.msra.mxu1 %v2541_v4  ;;  %v3169_v3 = vrot.slane %v418_v61, %v426_v62  ;;  %v3171_v4 = vrot.slane %v418_v61, %v434_v63 }
  0xa2   : > { %1522 = vmatprep.subr.bf16.mxu0 %v2546_v5  ;;  %1635 = vmatprep.subr.bf16.mxu1 %v2549_v6 }
  0xa3   : > { %663 = vmatmul.mubr.bf16.gmra.mxu0 %v381_v7  ;;  %776 = vmatmul.mubr.bf16.gmra.mxu1 %v381_v7 }
  0xa4   : > { %672 = vmatprep.mubr.bf16.mxu0 %v2912_v0  ;;  %785 = vmatprep.mubr.bf16.mxu1 %v2912_v0 }
  0xa5   : > { %1523 = vmatpush1.bf16.msra.mxu0 %v2544_v8  ;;  %1636 = vmatpush1.bf16.msra.mxu1 %v2547_v9 }
  0xa6   : > { %1524 = vmatprep.subr.bf16.mxu0 %v2552_v11  ;;  %1637 = vmatprep.subr.bf16.mxu1 %v2555_v12 }
  0xa9   : > { %1525 = vmatpush1.bf16.msra.mxu0 %v2550_v14  ;;  %1638 = vmatpush1.bf16.msra.mxu1 %v2553_v15 }
  0xaa   : > { %1526 = vmatprep.subr.bf16.mxu0 %v2558_v16  ;;  %1639 = vmatprep.subr.bf16.mxu1 %v2561_v17 }
  0xab   : > { %673 = vmatmul.mubr.bf16.gmra.mxu0 %v382_v18  ;;  %786 = vmatmul.mubr.bf16.gmra.mxu1 %v382_v18 }
  0xac   : > { %682 = vmatprep.mubr.bf16.mxu0 %v2912_v0  ;;  %795 = vmatprep.mubr.bf16.mxu1 %v2912_v0 }
  0xad   : > { %1527 = vmatpush2.bf16.msra.mxu0 %v2556_v19  ;;  %1640 = vmatpush2.bf16.msra.mxu1 %v2559_v20 }
  0xae   : > { %1528 = vmatprep.subr.bf16.mxu0 %v2564_v21  ;;  %1641 = vmatprep.subr.bf16.mxu1 %v2567_v22 }
  0xb1   : > { %1529 = vmatpush2.bf16.msra.mxu0 %v2562_v25  ;;  %1642 = vmatpush2.bf16.msra.mxu1 %v2565_v26 }
  0xb2   : > { %1530 = vmatprep.subr.bf16.mxu0 %v2570_v27  ;;  %1643 = vmatprep.subr.bf16.mxu1 %v2573_v28 }
  0xb3   : > { %683 = vmatmul.mubr.bf16.gmra.mxu0 %v383_v29  ;;  %796 = vmatmul.mubr.bf16.gmra.mxu1 %v383_v29 }
  0xb4   : > { %692 = vmatprep.mubr.bf16.mxu0 %v2912_v0  ;;  %805 = vmatprep.mubr.bf16.mxu1 %v2912_v0 }
  0xb5   : > { %1531 = vmatpush2.bf16.msra.mxu0 %v2568_v30  ;;  %1644 = vmatpush2.bf16.msra.mxu1 %v2571_v31 }
  0xb6   : > { %1532 = vmatprep.subr.bf16.mxu0 %v2576_v32  ;;  %1645 = vmatprep.subr.bf16.mxu1 %v2579_v33 }
  0xb9   : > { %1533 = vmatpush2.bf16.msra.mxu0 %v2574_v36  ;;  %1646 = vmatpush2.bf16.msra.mxu1 %v2577_v37 }
  0xba   : > { %1534 = vmatprep.subr.bf16.mxu0 %v2582_v38  ;;  %1647 = vmatprep.subr.bf16.mxu1 %v2585_v39 }
  0xbb   : > { %693 = vmatmul.mubr.bf16.gmra.mxu0 %v384_v40  ;;  %806 = vmatmul.mubr.bf16.gmra.mxu1 %v384_v40 }
  0xbc   : > { %702 = vmatprep.mubr.bf16.mxu0 %v2912_v0  ;;  %815 = vmatprep.mubr.bf16.mxu1 %v2912_v0  ;;  %v2595_v0 = vld [vmem:[#allocation8 + $0x190] ss:$8 sps:$4 sm:$0xff]  }
  0xbd   : > { %1535 = vmatpush2.bf16.msra.mxu0 %v2580_v41  ;;  %1648 = vmatpush2.bf16.msra.mxu1 %v2583_v42 }
  0xbe   : > { %1536 = vmatprep.subr.bf16.mxu0 %v2588_v46  ;;  %1649 = vmatprep.subr.bf16.mxu1 %v2591_v47 }
  0xc1   : > { %1537 = vmatpush2.bf16.msra.mxu0 %v2586_v48  ;;  %1650 = vmatpush2.bf16.msra.mxu1 %v2589_v49 }
  0xc2   : > { %1538 = vmatprep.subr.bf16.mxu0 %v2594_v50  ;;  %1651 = vmatprep.subr.bf16.mxu1 %v2597_v52 }
  0xc3   : > { %703 = vmatmul.mubr.bf16.gmra.mxu0 %v385_v45  ;;  %816 = vmatmul.mubr.bf16.gmra.mxu1 %v385_v45 }
  0xc5   : > { %1539 = vmatpush2.bf16.msra.mxu0 %v2592_v51  ;;  %1652 = vmatpush2.bf16.msra.mxu1 %v2595_v0 }
  0xc6   : > { %1540 = vmatprep.subr.bf16.mxu0 %v2600_v53  ;;  %1653 = vmatprep.subr.bf16.mxu1 %v2603_v54 }
  0xc9   : > { %1541 = vmatpush2.bf16.msra.mxu0 %v2598_v55  ;;  %1654 = vmatpush2.bf16.msra.mxu1 %v2601_v56 }
 0x14b   : > { %v634_v5 = vpop.f32.mrf.mxu0  ;;  %v747_v6 = vpop.f32.mrf.mxu1 }
 0x14c   : > { %v635_v7 = vadd.f32 %v634_v5, %v3163_v1  ;;  %v748_v8 = vadd.f32 %v747_v6, %v3165_v2 }
 0x14d   : > { %v636_v9 = vpop.f32.mrf.mxu0  ;;  %v749_v10 = vpop.f32.mrf.mxu1 }
 0x14e   : > { %v828_v11 = vmax.f32 %v748_v8, 0.0  ;;  %v637_v12 = vadd.f32 %v636_v9, %v3169_v3  ;;  %v750_v13 = vadd.f32 %v749_v10, %v3171_v4  ;;  %v826_v14 = vmax.f32 %v635_v7, 0.0 }
 0x14f   : > { %v638_v15 = vpop.f32.mrf.mxu0  ;;  %v751_v16 = vpop.f32.mrf.mxu1 }
 0x150   : > { %v827_v17 = vmax.f32 %v637_v12, 0.0  ;;  %v829_v18 = vmax.f32 %v750_v13, 0.0  ;;  %v639_v19 = vadd.f32 %v638_v15, %v3163_v1  ;;  %v752_v20 = vadd.f32 %v751_v16, %v3165_v2 }
 0x151   : > { %v640_v21 = vpop.f32.mrf.mxu0  ;;  %v753_v22 = vpop.f32.mrf.mxu1 }
 0x152   : > { %v2310_v23 = vpack.c.bf16 %v827_v17, %v826_v14  ;;  %v2311_v24 = vpack.c.bf16 %v829_v18, %v828_v11  ;;  %v830_v25 = vmax.f32 %v639_v19, 0.0  ;;  %v832_v26 = vmax.f32 %v752_v20, 0.0 }
 0x153   : > { %v641_v27 = vadd.f32 %v640_v21, %v3169_v3  ;;  %v754_v28 = vadd.f32 %v753_v22, %v3171_v4  ;;  %v644_v29 = vpop.f32.mrf.mxu0  ;;  %v757_v30 = vpop.f32.mrf.mxu1 }
 0x154   : > { %1082 = vst [vmem:[%s3184_s30] sm:$0xff] %v2310_v23  ;;  %1083 = vst [vmem:[%s3184_s30 + $0x8] sm:$0xff] %v2311_v24  ;;  %v645_v31 = vadd.f32 %v644_v29, %v3163_v1  ;;  %v758_v32 = vadd.f32 %v757_v30, %v3165_v2  ;;  %v890_v33 = vpack.c.bf16 %v830_v25, %v826_v14 }
 0x155   : > { %v892_v34 = vpack.c.bf16 %v832_v26, %v828_v11  ;;  %v831_v35 = vmax.f32 %v641_v27, 0.0  ;;  %v833_v36 = vmax.f32 %v754_v28, 0.0  ;;  %v646_v37 = vpop.f32.mrf.mxu0  ;;  %v759_v38 = vpop.f32.mrf.mxu1 }
 0x156   : > { %v834_v39 = vmax.f32 %v645_v31, 0.0  ;;  %v836_v40 = vmax.f32 %v758_v32, 0.0  ;;  %v647_v41 = vadd.f32 %v646_v37, %v3169_v3  ;;  %v760_v42 = vadd.f32 %v759_v38, %v3171_v4 }
 0x157   : > { %v891_v43 = vpack.c.bf16 %v831_v35, %v827_v17  ;;  %v2312_v44 = vpack.c.bf16 %v831_v35, %v830_v25  ;;  %v893_v45 = vpack.c.bf16 %v833_v36, %v829_v18  ;;  %v2313_v46 = vpack.c.bf16 %v833_v36, %v832_v26  ;;  %v648_v47 = vpop.f32.mrf.mxu0  ;;  %v761_v48 = vpop.f32.mrf.mxu1 }
 0x158   : > { %v835_v49 = vmax.f32 %v647_v41, 0.0  ;;  %v837_v50 = vmax.f32 %v760_v42, 0.0  ;;  %v649_v51 = vadd.f32 %v648_v47, %v3163_v1  ;;  %v762_v52 = vadd.f32 %v761_v48, %v3165_v2 }
 0x159   : > { %1084 = vst [vmem:[%s3184_s30 + $0x10] sm:$0xff] %v2312_v44  ;;  %1085 = vst [vmem:[%s3184_s30 + $0x18] sm:$0xff] %v2313_v46  ;;  %1542 = vmatprep.mubr.bf16.mxu0 %v891_v43  ;;  %1655 = vmatprep.mubr.bf16.mxu1 %v893_v45  ;;  %v650_v0 = vpop.f32.mrf.mxu0  ;;  %v763_v53 = vpop.f32.mrf.mxu1 }
 0x15a   : > { %v2314_v54 = vpack.c.bf16 %v835_v49, %v834_v39  ;;  %v2315_v55 = vpack.c.bf16 %v837_v50, %v836_v40  ;;  %v838_v56 = vmax.f32 %v649_v51, 0.0  ;;  %v840_v57 = vmax.f32 %v762_v52, 0.0  ;;  %1543 = vmatmul.mubr.bf16.vlgmr.msra.gmra.mxu0 %v890_v33  ;;  %1656 = vmatmul.mubr.bf16.vlgmr.msra.gmra.mxu1 %v892_v34 }
 0x15b   : > { %v651_v60 = vadd.f32 %v650_v0, %v3169_v3  ;;  %v764_v61 = vadd.f32 %v763_v53, %v3171_v4  ;;  %v654_v63 = vpop.f32.mrf.mxu0  ;;  %v767_v5 = vpop.f32.mrf.mxu1 }
 0x15c   : > { %1086 = vst [vmem:[%s3184_s30 + $0x20] sm:$0xff] %v2314_v54  ;;  %1087 = vst [vmem:[%s3184_s30 + $0x28] sm:$0xff] %v2315_v55  ;;  %v655_v6 = vadd.f32 %v654_v63, %v3163_v1  ;;  %v768_v7 = vadd.f32 %v767_v5, %v3165_v2  ;;  %v894_v8 = vpack.c.bf16 %v838_v56, %v834_v39 }
 0x15d   : > { %v896_v9 = vpack.c.bf16 %v840_v57, %v836_v40  ;;  %v839_v10 = vmax.f32 %v651_v60, 0.0  ;;  %v841_v11 = vmax.f32 %v764_v61, 0.0  ;;  %v656_v12 = vpop.f32.mrf.mxu0  ;;  %v769_v13 = vpop.f32.mrf.mxu1 }
 0x15e   : > { %v842_v14 = vmax.f32 %v655_v6, 0.0  ;;  %v844_v15 = vmax.f32 %v768_v7, 0.0  ;;  %v657_v16 = vadd.f32 %v656_v12, %v3169_v3  ;;  %v770_v17 = vadd.f32 %v769_v13, %v3171_v4 }
 0x15f   : > { %v895_v18 = vpack.c.bf16 %v839_v10, %v835_v49  ;;  %v2316_v19 = vpack.c.bf16 %v839_v10, %v838_v56  ;;  %v897_v20 = vpack.c.bf16 %v841_v11, %v837_v50  ;;  %v2317_v21 = vpack.c.bf16 %v841_v11, %v840_v57  ;;  %v658_v22 = vpop.f32.mrf.mxu0  ;;  %v771_v23 = vpop.f32.mrf.mxu1 }
 0x160   : > { %v843_v24 = vmax.f32 %v657_v16, 0.0  ;;  %v845_v25 = vmax.f32 %v770_v17, 0.0  ;;  %v659_v26 = vadd.f32 %v658_v22, %v3163_v1  ;;  %v772_v27 = vadd.f32 %v771_v23, %v3165_v2 }
 0x161   : > { %1088 = vst [vmem:[%s3184_s30 + $0x30] sm:$0xff] %v2316_v19  ;;  %1089 = vst [vmem:[%s3184_s30 + $0x38] sm:$0xff] %v2317_v21  ;;  %1552 = vmatprep.mubr.bf16.mxu0 %v895_v18  ;;  %1665 = vmatprep.mubr.bf16.mxu1 %v897_v20  ;;  %v660_v28 = vpop.f32.mrf.mxu0  ;;  %v773_v29 = vpop.f32.mrf.mxu1 }
 0x162   : > { %v2318_v30 = vpack.c.bf16 %v843_v24, %v842_v14  ;;  %v2319_v31 = vpack.c.bf16 %v845_v25, %v844_v15  ;;  %v846_v32 = vmax.f32 %v659_v26, 0.0  ;;  %v848_v33 = vmax.f32 %v772_v27, 0.0  ;;  %1553 = vmatmul.mubr.bf16.gmra.mxu0 %v894_v8  ;;  %1666 = vmatmul.mubr.bf16.gmra.mxu1 %v896_v9 }
 0x163   : > { %v661_v34 = vadd.f32 %v660_v28, %v3169_v3  ;;  %v774_v35 = vadd.f32 %v773_v29, %v3171_v4  ;;  %v664_v36 = vpop.f32.mrf.mxu0  ;;  %v777_v37 = vpop.f32.mrf.mxu1 }
 0x164   : > { %1090 = vst [vmem:[%s3184_s30 + $0x40] sm:$0xff] %v2318_v30  ;;  %1091 = vst [vmem:[%s3184_s30 + $0x48] sm:$0xff] %v2319_v31  ;;  %v665_v38 = vadd.f32 %v664_v36, %v3163_v1  ;;  %v778_v39 = vadd.f32 %v777_v37, %v3165_v2  ;;  %v898_v40 = vpack.c.bf16 %v846_v32, %v842_v14 }
 0x165   : > { %v900_v41 = vpack.c.bf16 %v848_v33, %v844_v15  ;;  %v847_v42 = vmax.f32 %v661_v34, 0.0  ;;  %v849_v43 = vmax.f32 %v774_v35, 0.0  ;;  %v666_v44 = vpop.f32.mrf.mxu0  ;;  %v779_v45 = vpop.f32.mrf.mxu1 }
 0x166   : > { %v850_v46 = vmax.f32 %v665_v38, 0.0  ;;  %v852_v47 = vmax.f32 %v778_v39, 0.0  ;;  %v667_v48 = vadd.f32 %v666_v44, %v3169_v3  ;;  %v780_v49 = vadd.f32 %v779_v45, %v3171_v4 }
 0x167   : > { %v899_v50 = vpack.c.bf16 %v847_v42, %v843_v24  ;;  %v2320_v51 = vpack.c.bf16 %v847_v42, %v846_v32  ;;  %v901_v52 = vpack.c.bf16 %v849_v43, %v845_v25  ;;  %v2321_v0 = vpack.c.bf16 %v849_v43, %v848_v33  ;;  %v668_v53 = vpop.f32.mrf.mxu0  ;;  %v781_v54 = vpop.f32.mrf.mxu1 }
 0x168   : > { %v851_v55 = vmax.f32 %v667_v48, 0.0  ;;  %v853_v56 = vmax.f32 %v780_v49, 0.0  ;;  %v669_v57 = vadd.f32 %v668_v53, %v3163_v1  ;;  %v782_v60 = vadd.f32 %v781_v54, %v3165_v2 }
 0x169   : > { %1092 = vst [vmem:[%s3184_s30 + $0x50] sm:$0xff] %v2320_v51  ;;  %1093 = vst [vmem:[%s3184_s30 + $0x58] sm:$0xff] %v2321_v0  ;;  %1562 = vmatprep.mubr.bf16.mxu0 %v899_v50  ;;  %1675 = vmatprep.mubr.bf16.mxu1 %v901_v52  ;;  %v670_v61 = vpop.f32.mrf.mxu0  ;;  %v783_v63 = vpop.f32.mrf.mxu1 }
 0x16a   : > { %v2322_v5 = vpack.c.bf16 %v851_v55, %v850_v46  ;;  %v2323_v6 = vpack.c.bf16 %v853_v56, %v852_v47  ;;  %v854_v7 = vmax.f32 %v669_v57, 0.0  ;;  %v856_v8 = vmax.f32 %v782_v60, 0.0  ;;  %1563 = vmatmul.mubr.bf16.gmra.mxu0 %v898_v40  ;;  %1676 = vmatmul.mubr.bf16.gmra.mxu1 %v900_v41 }
 0x16b   : > { %v671_v9 = vadd.f32 %v670_v61, %v3169_v3  ;;  %v784_v10 = vadd.f32 %v783_v63, %v3171_v4  ;;  %v674_v11 = vpop.f32.mrf.mxu0  ;;  %v787_v12 = vpop.f32.mrf.mxu1 }
 0x16c   : > { %1094 = vst [vmem:[%s3184_s30 + $0x60] sm:$0xff] %v2322_v5  ;;  %1095 = vst [vmem:[%s3184_s30 + $0x68] sm:$0xff] %v2323_v6  ;;  %v675_v13 = vadd.f32 %v674_v11, %v3163_v1  ;;  %v788_v14 = vadd.f32 %v787_v12, %v3165_v2  ;;  %v902_v15 = vpack.c.bf16 %v854_v7, %v850_v46 }
 0x16d   : > { %v904_v16 = vpack.c.bf16 %v856_v8, %v852_v47  ;;  %v855_v17 = vmax.f32 %v671_v9, 0.0  ;;  %v857_v18 = vmax.f32 %v784_v10, 0.0  ;;  %v676_v19 = vpop.f32.mrf.mxu0  ;;  %v789_v20 = vpop.f32.mrf.mxu1 }
 0x16e   : > { %v858_v21 = vmax.f32 %v675_v13, 0.0  ;;  %v860_v22 = vmax.f32 %v788_v14, 0.0  ;;  %v677_v23 = vadd.f32 %v676_v19, %v3169_v3  ;;  %v790_v24 = vadd.f32 %v789_v20, %v3171_v4 }
 0x16f   : > { %v903_v25 = vpack.c.bf16 %v855_v17, %v851_v55  ;;  %v2324_v26 = vpack.c.bf16 %v855_v17, %v854_v7  ;;  %v905_v27 = vpack.c.bf16 %v857_v18, %v853_v56  ;;  %v2325_v28 = vpack.c.bf16 %v857_v18, %v856_v8  ;;  %v678_v29 = vpop.f32.mrf.mxu0  ;;  %v791_v30 = vpop.f32.mrf.mxu1 }
 0x170   : > { %v859_v31 = vmax.f32 %v677_v23, 0.0  ;;  %v861_v32 = vmax.f32 %v790_v24, 0.0  ;;  %v679_v33 = vadd.f32 %v678_v29, %v3163_v1  ;;  %v792_v34 = vadd.f32 %v791_v30, %v3165_v2 }
 0x171   : > { %1096 = vst [vmem:[%s3184_s30 + $0x70] sm:$0xff] %v2324_v26  ;;  %1097 = vst [vmem:[%s3184_s30 + $0x78] sm:$0xff] %v2325_v28  ;;  %1572 = vmatprep.mubr.bf16.mxu0 %v903_v25  ;;  %1685 = vmatprep.mubr.bf16.mxu1 %v905_v27  ;;  %v680_v35 = vpop.f32.mrf.mxu0  ;;  %v793_v36 = vpop.f32.mrf.mxu1 }
 0x172   : > { %v2326_v37 = vpack.c.bf16 %v859_v31, %v858_v21  ;;  %v2327_v38 = vpack.c.bf16 %v861_v32, %v860_v22  ;;  %v862_v39 = vmax.f32 %v679_v33, 0.0  ;;  %v864_v40 = vmax.f32 %v792_v34, 0.0  ;;  %1573 = vmatmul.mubr.bf16.gmra.mxu0 %v902_v15  ;;  %1686 = vmatmul.mubr.bf16.gmra.mxu1 %v904_v16 }
 0x173   : > { %v681_v41 = vadd.f32 %v680_v35, %v3169_v3  ;;  %v794_v42 = vadd.f32 %v793_v36, %v3171_v4  ;;  %v684_v43 = vpop.f32.mrf.mxu0  ;;  %v797_v44 = vpop.f32.mrf.mxu1 }
 0x174   : > { %1098 = vst [vmem:[%s3184_s30 + $0x80] sm:$0xff] %v2326_v37  ;;  %1099 = vst [vmem:[%s3184_s30 + $0x88] sm:$0xff] %v2327_v38  ;;  %v685_v45 = vadd.f32 %v684_v43, %v3163_v1  ;;  %v798_v46 = vadd.f32 %v797_v44, %v3165_v2  ;;  %v906_v47 = vpack.c.bf16 %v862_v39, %v858_v21 }
 0x175   : > { %v908_v48 = vpack.c.bf16 %v864_v40, %v860_v22  ;;  %v863_v49 = vmax.f32 %v681_v41, 0.0  ;;  %v865_v50 = vmax.f32 %v794_v42, 0.0  ;;  %v686_v51 = vpop.f32.mrf.mxu0  ;;  %v799_v52 = vpop.f32.mrf.mxu1 }
 0x176   : > { %v866_v0 = vmax.f32 %v685_v45, 0.0  ;;  %v868_v53 = vmax.f32 %v798_v46, 0.0  ;;  %v687_v54 = vadd.f32 %v686_v51, %v3169_v3  ;;  %v800_v55 = vadd.f32 %v799_v52, %v3171_v4 }
 0x177   : > { %v907_v56 = vpack.c.bf16 %v863_v49, %v859_v31  ;;  %v2328_v57 = vpack.c.bf16 %v863_v49, %v862_v39  ;;  %v909_v60 = vpack.c.bf16 %v865_v50, %v861_v32  ;;  %v2329_v61 = vpack.c.bf16 %v865_v50, %v864_v40  ;;  %v688_v63 = vpop.f32.mrf.mxu0  ;;  %v801_v5 = vpop.f32.mrf.mxu1 }
 0x178   : > { %v867_v6 = vmax.f32 %v687_v54, 0.0  ;;  %v869_v7 = vmax.f32 %v800_v55, 0.0  ;;  %v689_v8 = vadd.f32 %v688_v63, %v3163_v1  ;;  %v802_v9 = vadd.f32 %v801_v5, %v3165_v2 }
 0x179   : > { %1100 = vst [vmem:[%s3184_s30 + $0x90] sm:$0xff] %v2328_v57  ;;  %1101 = vst [vmem:[%s3184_s30 + $0x98] sm:$0xff] %v2329_v61  ;;  %1582 = vmatprep.mubr.bf16.mxu0 %v907_v56  ;;  %1695 = vmatprep.mubr.bf16.mxu1 %v909_v60  ;;  %v690_v10 = vpop.f32.mrf.mxu0  ;;  %v803_v11 = vpop.f32.mrf.mxu1 }
 0x17a   : > { %v2330_v12 = vpack.c.bf16 %v867_v6, %v866_v0  ;;  %v2331_v13 = vpack.c.bf16 %v869_v7, %v868_v53  ;;  %v870_v14 = vmax.f32 %v689_v8, 0.0  ;;  %v872_v15 = vmax.f32 %v802_v9, 0.0  ;;  %1583 = vmatmul.mubr.bf16.gmra.mxu0 %v906_v47  ;;  %1696 = vmatmul.mubr.bf16.gmra.mxu1 %v908_v48 }
 0x17b   : > { %v691_v16 = vadd.f32 %v690_v10, %v3169_v3  ;;  %v804_v17 = vadd.f32 %v803_v11, %v3171_v4  ;;  %v694_v18 = vpop.f32.mrf.mxu0  ;;  %v807_v19 = vpop.f32.mrf.mxu1 }
 0x17c   : > { %1102 = vst [vmem:[%s3184_s30 + $0xa0] sm:$0xff] %v2330_v12  ;;  %1103 = vst [vmem:[%s3184_s30 + $0xa8] sm:$0xff] %v2331_v13  ;;  %v695_v20 = vadd.f32 %v694_v18, %v3163_v1  ;;  %v808_v21 = vadd.f32 %v807_v19, %v3165_v2  ;;  %v910_v22 = vpack.c.bf16 %v870_v14, %v866_v0 }
 0x17d   : > { %v912_v23 = vpack.c.bf16 %v872_v15, %v868_v53  ;;  %v871_v24 = vmax.f32 %v691_v16, 0.0  ;;  %v873_v25 = vmax.f32 %v804_v17, 0.0  ;;  %v696_v26 = vpop.f32.mrf.mxu0  ;;  %v809_v27 = vpop.f32.mrf.mxu1 }
 0x17e   : > { %v874_v28 = vmax.f32 %v695_v20, 0.0  ;;  %v876_v29 = vmax.f32 %v808_v21, 0.0  ;;  %v697_v30 = vadd.f32 %v696_v26, %v3169_v3  ;;  %v810_v31 = vadd.f32 %v809_v27, %v3171_v4 }
 0x17f   : > { %v911_v32 = vpack.c.bf16 %v871_v24, %v867_v6  ;;  %v2332_v33 = vpack.c.bf16 %v871_v24, %v870_v14  ;;  %v913_v34 = vpack.c.bf16 %v873_v25, %v869_v7  ;;  %v2333_v35 = vpack.c.bf16 %v873_v25, %v872_v15  ;;  %v698_v36 = vpop.f32.mrf.mxu0  ;;  %v811_v37 = vpop.f32.mrf.mxu1 }
 0x180   : > { %v875_v38 = vmax.f32 %v697_v30, 0.0  ;;  %v877_v39 = vmax.f32 %v810_v31, 0.0  ;;  %v699_v40 = vadd.f32 %v698_v36, %v3163_v1  ;;  %v812_v41 = vadd.f32 %v811_v37, %v3165_v2 }
 0x181   : > { %1104 = vst [vmem:[%s3184_s30 + $0xb0] sm:$0xff] %v2332_v33  ;;  %1105 = vst [vmem:[%s3184_s30 + $0xb8] sm:$0xff] %v2333_v35  ;;  %1592 = vmatprep.mubr.bf16.mxu0 %v911_v32  ;;  %1705 = vmatprep.mubr.bf16.mxu1 %v913_v34  ;;  %v700_v42 = vpop.f32.mrf.mxu0  ;;  %v813_v43 = vpop.f32.mrf.mxu1 }
 0x182   : > { %v2334_v44 = vpack.c.bf16 %v875_v38, %v874_v28  ;;  %v2335_v45 = vpack.c.bf16 %v877_v39, %v876_v29  ;;  %v878_v46 = vmax.f32 %v699_v40, 0.0  ;;  %v880_v47 = vmax.f32 %v812_v41, 0.0  ;;  %1593 = vmatmul.mubr.bf16.gmra.mxu0 %v910_v22  ;;  %1706 = vmatmul.mubr.bf16.gmra.mxu1 %v912_v23 }
 0x183   : > { %v701_v48 = vadd.f32 %v700_v42, %v3169_v3  ;;  %v814_v49 = vadd.f32 %v813_v43, %v3171_v4  ;;  %v704_v50 = vpop.f32.mrf.mxu0  ;;  %v817_v51 = vpop.f32.mrf.mxu1 }
 0x184   : > { %1106 = vst [vmem:[%s3184_s30 + $0xc0] sm:$0xff] %v2334_v44  ;;  %1107 = vst [vmem:[%s3184_s30 + $0xc8] sm:$0xff] %v2335_v45  ;;  %v705_v52 = vadd.f32 %v704_v50, %v3163_v1  ;;  %v818_v0 = vadd.f32 %v817_v51, %v3165_v2  ;;  %v914_v53 = vpack.c.bf16 %v878_v46, %v874_v28 }
 0x185   : > { %v916_v54 = vpack.c.bf16 %v880_v47, %v876_v29  ;;  %v879_v55 = vmax.f32 %v701_v48, 0.0  ;;  %v881_v56 = vmax.f32 %v814_v49, 0.0  ;;  %v706_v57 = vpop.f32.mrf.mxu0  ;;  %v819_v60 = vpop.f32.mrf.mxu1 }
 0x186   : > { %v882_v61 = vmax.f32 %v705_v52, 0.0  ;;  %v884_v63 = vmax.f32 %v818_v0, 0.0  ;;  %v707_v5 = vadd.f32 %v706_v57, %v3169_v3  ;;  %v820_v6 = vadd.f32 %v819_v60, %v3171_v4 }
 0x187   : > { %v915_v7 = vpack.c.bf16 %v879_v55, %v875_v38  ;;  %v2336_v8 = vpack.c.bf16 %v879_v55, %v878_v46  ;;  %v917_v9 = vpack.c.bf16 %v881_v56, %v877_v39  ;;  %v2337_v10 = vpack.c.bf16 %v881_v56, %v880_v47  ;;  %v708_v11 = vpop.f32.mrf.mxu0  ;;  %v821_v12 = vpop.f32.mrf.mxu1 }
 0x188   : > { %v883_v13 = vmax.f32 %v707_v5, 0.0  ;;  %v885_v14 = vmax.f32 %v820_v6, 0.0  ;;  %v709_v15 = vadd.f32 %v708_v11, %v3163_v1  ;;  %v822_v16 = vadd.f32 %v821_v12, %v3165_v2 }
 0x189   : > { %1108 = vst [vmem:[%s3184_s30 + $0xd0] sm:$0xff] %v2336_v8  ;;  %1109 = vst [vmem:[%s3184_s30 + $0xd8] sm:$0xff] %v2337_v10  ;;  %1602 = vmatprep.mubr.bf16.mxu0 %v915_v7  ;;  %1715 = vmatprep.mubr.bf16.mxu1 %v917_v9  ;;  %v710_v17 = vpop.f32.mrf.mxu0  ;;  %v823_v18 = vpop.f32.mrf.mxu1 }
 0x18a   : > { %v2338_v19 = vpack.c.bf16 %v883_v13, %v882_v61  ;;  %v2339_v20 = vpack.c.bf16 %v885_v14, %v884_v63  ;;  %1603 = vmatmul.mubr.bf16.gmra.mxu0 %v914_v53  ;;  %1716 = vmatmul.mubr.bf16.gmra.mxu1 %v916_v54  ;;  %v711_v21 = vadd.f32 %v710_v17, %v3169_v3  ;;  %v886_v1 = vmax.f32 %v709_v15, 0.0 }
 0x18b   : > { %v824_v22 = vadd.f32 %v823_v18, %v3171_v4  ;;  %v888_v2 = vmax.f32 %v822_v16, 0.0 }
 0x18c   : > { %1110 = vst [vmem:[%s3184_s30 + $0xe0] sm:$0xff] %v2338_v19  ;;  %1111 = vst [vmem:[%s3184_s30 + $0xe8] sm:$0xff] %v2339_v20  ;;  %v887_v23 = vmax.f32 %v711_v21, 0.0  ;;  %v918_v29 = vpack.c.bf16 %v886_v1, %v882_v61 }
 0x18d   : > { %v889_v24 = vmax.f32 %v824_v22, 0.0  ;;  %v920_v30 = vpack.c.bf16 %v888_v2, %v884_v63 }
 0x18e   : > { %v919_v25 = vpack.c.bf16 %v887_v23, %v883_v13  ;;  %v2340_v26 = vpack.c.bf16 %v887_v23, %v886_v1 }
 0x18f   : > { %v921_v27 = vpack.c.bf16 %v889_v24, %v885_v14  ;;  %v2341_v28 = vpack.c.bf16 %v889_v24, %v888_v2 }
 0x190   : > { %1112 = vst [vmem:[%s3184_s30 + $0xf0] sm:$0xff] %v2340_v26  ;;  %1612 = vmatprep.mubr.bf16.mxu0 %v919_v25 }
 0x191   : > { %1113 = vst [vmem:[%s3184_s30 + $0xf8] sm:$0xff] %v2341_v28  ;;  %1725 = vmatprep.mubr.bf16.mxu1 %v921_v27 }
 0x192   : > { %1613 = vmatmul.mubr.bf16.gmra.mxu0 %v918_v29  ;;  %1726 = vmatmul.mubr.bf16.gmra.mxu1 %v920_v30 }
 0x193   : > { %2787 = shalt.err (!%p2784_p9)
}
 0x194   : > { %s2788_s20 = scalar_lea.hbm %s3280_s11, 4096  ;;  %s2792_s19 = scalar_lea.hbm %s3502_s5, 8192 }
 0x195   : > { %p2789_p1 = scmp.ne.s32.totalorder %s3280_s11, %s2788_s20  ;;  %p2793_p11 = scmp.lt.s32.totalorder %s3280_s11, %s3502_s5 }
 0x196   : > { %p2794_p13 = scmp.lt.s32.totalorder %s2792_s19, %s2788_s20 }
 0x197   : > { %p2790_p8 = pnand %p2789_p1, %p3530_p6 }
 0x198   : > { %p2795_p2 = por %p2794_p13, %p2793_p11 }
 0x199   : > { %p2791_p10 = pneg %p2790_p8 }
 0x19b   : > { %p2796_p4 = pnand %p2795_p2, %p2791_p10 }
 0x19d   : > { %2799 = shalt.err (!%p2796_p4)
}
 0x19e   : > { %s2914_s23 = smov 256   ;;  %s2915_s10 = smov 16   ;;  %v1178_v3 = vld [vmem:[%s3501_s4] sm:$0x3] }
 0x19f   : > { %2378 = dma.vmem_to_hbm [thread:$0]  (%p3530_p6), %s3283_s17, 4096, %s3280_s11, %s1913_s22, %s2914_s23, %s2914_s23, %s2915_s10   ;;  %v3316_v4 = vrot.slane %v1178_v3, %v422_v59  ;;  %v3320_v31 = vrot.slane %v1178_v3, %v426_v62 }
 0x1a0   : > { %s3326_s11 = scalar_lea.vmem [#allocation11], %s2148_s29  ;;  %s3348_s29 = scalar_lea.vmem [#allocation13], %s2144_s1 }
 0x1a1   : > { %s1917_s14 = sand.u32 1, %s2981_s28   ;;  %s1954_s1 = sshll.u32 %s3326_s11, 4  ;;  %s3413_s1 = int_to_ptr.vmem [resolvable:$true] %s1954_s1 }
 0x1a2   : > { %s3531_s17 = sshll.u32 %s2981_s28, 12  ;;  %s3417_s15 = scalar_lea.sflag [#allocation12], %s1917_s14 }
 0x1a3   : > { %s3411_s30 = scalar_lea.hbm %s3503_s6, %s3531_s17  ;;  %s2800_s19 = scalar_lea.vmem %s3413_s1, 4096 }
 0x1a4   : > { %p2801_p12 = scmp.ne.s32.totalorder %s3413_s1, %s2800_s19  ;;  %s2916_s13 = smov [#allocation11]  }
 0x1a5   : > { %s2804_s16 = sshll.u32 %s2916_s13, 4  ;;  %s2805_s16 = int_to_ptr.vmem [resolvable:$false] %s2804_s16 }
 0x1a6   : > { %p2802_p0 = pnand %p2801_p12, %p3530_p6  ;;  %s2806_s9 = scalar_lea.vmem %s2805_s16, 8192 }
 0x1a7   : > { %p2807_p3 = scmp.lt.s32.totalorder %s3413_s1, %s2805_s16  ;;  %p2808_p7 = scmp.lt.s32.totalorder %s2806_s9, %s2800_s19 }
 0x1a8   : > { %p2803_p5 = pneg %p2802_p0 }
 0x1a9   : > { %p2809_p9 = por %p2808_p7, %p2807_p3 }
 0x1ab   : > { %p2810_p1 = pnand %p2809_p9, %p2803_p5 }
 0x21a   : > { %v1544_v32 = vpop.f32.mrf.mxu0  ;;  %v1657_v33 = vpop.f32.mrf.mxu1 }
 0x21b   : > { %v1545_v34 = vadd.f32 %v1544_v32, %v3316_v4 }
 0x21c   : > { %v1546_v35 = vpop.f32.mrf.mxu0  ;;  %v1659_v36 = vpop.f32.mrf.mxu1 }
 0x21d   : > { %v1658_v37 = vadd.f32 %v1657_v33, %v1545_v34  ;;  %v1547_v38 = vadd.f32 %v1546_v35, %v3320_v31 }
 0x21e   : > { %v1548_v39 = vpop.f32.mrf.mxu0  ;;  %v1661_v40 = vpop.f32.mrf.mxu1 }
 0x21f   : > { %1736 = vst [vmem:[%s3326_s11] sm:$0xff] %v1658_v37  ;;  %v1660_v58 = vadd.f32 %v1659_v36, %v1547_v38  ;;  %v1549_v59 = vadd.f32 %v1548_v39, %v3316_v4  ;;  %2604 = vtanh.f32 %v1658_v37 }
 0x220   : > { %v1550_v62 = vpop.f32.mrf.mxu0  ;;  %v1663_v41 = vpop.f32.mrf.mxu1 }
 0x221   : > { %1737 = vst [vmem:[%s3326_s11 + $0x8] sm:$0xff] %v1660_v58  ;;  %2606 = vtanh.f32 %v1660_v58  ;;  %v1662_v42 = vadd.f32 %v1661_v40, %v1549_v59  ;;  %v1551_v43 = vadd.f32 %v1550_v62, %v3320_v31 }
 0x222   : > { %v1554_v44 = vpop.f32.mrf.mxu0  ;;  %v1667_v45 = vpop.f32.mrf.mxu1 }
 0x223   : > { %1738 = vst [vmem:[%s3326_s11 + $0x10] sm:$0xff] %v1662_v42  ;;  %v1664_v46 = vadd.f32 %v1663_v41, %v1551_v43  ;;  %v1555_v47 = vadd.f32 %v1554_v44, %v3316_v4  ;;  %2608 = vtanh.f32 %v1662_v42 }
 0x224   : > { %v1556_v48 = vpop.f32.mrf.mxu0  ;;  %v1669_v49 = vpop.f32.mrf.mxu1 }
 0x225   : > { %1739 = vst [vmem:[%s3326_s11 + $0x18] sm:$0xff] %v1664_v46  ;;  %2610 = vtanh.f32 %v1664_v46  ;;  %v1668_v50 = vadd.f32 %v1667_v45, %v1555_v47  ;;  %v1557_v51 = vadd.f32 %v1556_v48, %v3320_v31 }
 0x226   : > { %v1558_v52 = vpop.f32.mrf.mxu0  ;;  %v1671_v0 = vpop.f32.mrf.mxu1 }
 0x227   : > { %1740 = vst [vmem:[%s3326_s11 + $0x20] sm:$0xff] %v1668_v50  ;;  %v1670_v53 = vadd.f32 %v1669_v49, %v1557_v51  ;;  %v1559_v54 = vadd.f32 %v1558_v52, %v3316_v4  ;;  %2612 = vtanh.f32 %v1668_v50 }
 0x228   : > { %v1560_v55 = vpop.f32.mrf.mxu0  ;;  %v1673_v56 = vpop.f32.mrf.mxu1 }
 0x229   : > { %1741 = vst [vmem:[%s3326_s11 + $0x28] sm:$0xff] %v1670_v53  ;;  %2614 = vtanh.f32 %v1670_v53  ;;  %v1672_v57 = vadd.f32 %v1671_v0, %v1559_v54  ;;  %v1561_v60 = vadd.f32 %v1560_v55, %v3320_v31 }
 0x22a   : > { %v1564_v61 = vpop.f32.mrf.mxu0  ;;  %v1677_v63 = vpop.f32.mrf.mxu1 }
 0x22b   : > { %1742 = vst [vmem:[%s3326_s11 + $0x30] sm:$0xff] %v1672_v57  ;;  %v1674_v5 = vadd.f32 %v1673_v56, %v1561_v60  ;;  %v1565_v6 = vadd.f32 %v1564_v61, %v3316_v4  ;;  %2616 = vtanh.f32 %v1672_v57 }
 0x22c   : > { %v1566_v7 = vpop.f32.mrf.mxu0  ;;  %v1679_v8 = vpop.f32.mrf.mxu1 }
 0x22d   : > { %v2605_v9 = vpop.eup %2604  ;;  %1743 = vst [vmem:[%s3326_s11 + $0x38] sm:$0xff] %v1674_v5  ;;  %2618 = vtanh.f32 %v1674_v5  ;;  %v1678_v10 = vadd.f32 %v1677_v63, %v1565_v6  ;;  %v1567_v11 = vadd.f32 %v1566_v7, %v3320_v31 }
 0x22e   : > { %v2607_v12 = vpop.eup %2606  ;;  %v1568_v13 = vpop.f32.mrf.mxu0 }
 0x22f   : > { %v1681_v14 = vpop.f32.mrf.mxu1  ;;  %v2342_v15 = vpack.c.bf16 %v2607_v12, %v2605_v9  ;;  %1744 = vst [vmem:[%s3326_s11 + $0x40] sm:$0xff] %v1678_v10  ;;  %v1680_v16 = vadd.f32 %v1679_v8, %v1567_v11  ;;  %v1569_v17 = vadd.f32 %v1568_v13, %v3316_v4  ;;  %2620 = vtanh.f32 %v1678_v10 }
 0x230   : > { %v1570_v18 = vpop.f32.mrf.mxu0  ;;  %v2609_v20 = vpop.eup %2608 }
 0x231   : > { %v1683_v19 = vpop.f32.mrf.mxu1  ;;  %1896 = vst [vmem:[%s3348_s29] sm:$0xff] %v2342_v15  ;;  %1745 = vst [vmem:[%s3326_s11 + $0x48] sm:$0xff] %v1680_v16  ;;  %2622 = vtanh.f32 %v1680_v16  ;;  %v1682_v21 = vadd.f32 %v1681_v14, %v1569_v17  ;;  %v1571_v22 = vadd.f32 %v1570_v18, %v3320_v31 }
 0x232   : > { %v2611_v1 = vpop.eup %2610  ;;  %v1574_v2 = vpop.f32.mrf.mxu0 }
 0x233   : > { %v1687_v23 = vpop.f32.mrf.mxu1  ;;  %v2343_v24 = vpack.c.bf16 %v2611_v1, %v2609_v20  ;;  %1746 = vst [vmem:[%s3326_s11 + $0x50] sm:$0xff] %v1682_v21  ;;  %v1684_v25 = vadd.f32 %v1683_v19, %v1571_v22  ;;  %v1575_v26 = vadd.f32 %v1574_v2, %v3316_v4  ;;  %2624 = vtanh.f32 %v1682_v21 }
 0x234   : > { %v1576_v27 = vpop.f32.mrf.mxu0  ;;  %v2613_v29 = vpop.eup %2612 }
 0x235   : > { %v1689_v28 = vpop.f32.mrf.mxu1  ;;  %1897 = vst [vmem:[%s3348_s29 + $0x8] sm:$0xff] %v2343_v24  ;;  %1747 = vst [vmem:[%s3326_s11 + $0x58] sm:$0xff] %v1684_v25  ;;  %2626 = vtanh.f32 %v1684_v25  ;;  %v1688_v30 = vadd.f32 %v1687_v23, %v1575_v26  ;;  %v1577_v3 = vadd.f32 %v1576_v27, %v3320_v31 }
 0x236   : > { %v2615_v32 = vpop.eup %2614  ;;  %v1578_v33 = vpop.f32.mrf.mxu0 }
 0x237   : > { %v1691_v34 = vpop.f32.mrf.mxu1  ;;  %v2344_v35 = vpack.c.bf16 %v2615_v32, %v2613_v29  ;;  %1748 = vst [vmem:[%s3326_s11 + $0x60] sm:$0xff] %v1688_v30  ;;  %v1690_v36 = vadd.f32 %v1689_v28, %v1577_v3  ;;  %v1579_v37 = vadd.f32 %v1578_v33, %v3316_v4  ;;  %2628 = vtanh.f32 %v1688_v30 }
 0x238   : > { %v1580_v38 = vpop.f32.mrf.mxu0  ;;  %v2617_v40 = vpop.eup %2616 }
 0x239   : > { %v1693_v39 = vpop.f32.mrf.mxu1  ;;  %1898 = vst [vmem:[%s3348_s29 + $0x10] sm:$0xff] %v2344_v35  ;;  %1749 = vst [vmem:[%s3326_s11 + $0x68] sm:$0xff] %v1690_v36  ;;  %2630 = vtanh.f32 %v1690_v36  ;;  %v1692_v58 = vadd.f32 %v1691_v34, %v1579_v37  ;;  %v1581_v59 = vadd.f32 %v1580_v38, %v3320_v31 }
 0x23a   : > { %v2619_v62 = vpop.eup %2618  ;;  %v1584_v41 = vpop.f32.mrf.mxu0 }
 0x23b   : > { %v1697_v42 = vpop.f32.mrf.mxu1  ;;  %v2345_v43 = vpack.c.bf16 %v2619_v62, %v2617_v40  ;;  %1750 = vst [vmem:[%s3326_s11 + $0x70] sm:$0xff] %v1692_v58  ;;  %v1694_v44 = vadd.f32 %v1693_v39, %v1581_v59  ;;  %v1585_v45 = vadd.f32 %v1584_v41, %v3316_v4  ;;  %2632 = vtanh.f32 %v1692_v58 }
 0x23c   : > { %v1586_v46 = vpop.f32.mrf.mxu0  ;;  %v2621_v48 = vpop.eup %2620 }
 0x23d   : > { %v1699_v47 = vpop.f32.mrf.mxu1  ;;  %1899 = vst [vmem:[%s3348_s29 + $0x18] sm:$0xff] %v2345_v43  ;;  %1751 = vst [vmem:[%s3326_s11 + $0x78] sm:$0xff] %v1694_v44  ;;  %2634 = vtanh.f32 %v1694_v44  ;;  %v1698_v49 = vadd.f32 %v1697_v42, %v1585_v45  ;;  %v1587_v50 = vadd.f32 %v1586_v46, %v3320_v31 }
 0x23e   : > { %v2623_v51 = vpop.eup %2622  ;;  %v1588_v52 = vpop.f32.mrf.mxu0 }
 0x23f   : > { %v1701_v0 = vpop.f32.mrf.mxu1  ;;  %v2346_v53 = vpack.c.bf16 %v2623_v51, %v2621_v48  ;;  %1752 = vst [vmem:[%s3326_s11 + $0x80] sm:$0xff] %v1698_v49  ;;  %v1700_v54 = vadd.f32 %v1699_v47, %v1587_v50  ;;  %v1589_v55 = vadd.f32 %v1588_v52, %v3316_v4  ;;  %2636 = vtanh.f32 %v1698_v49 }
 0x240   : > { %v1590_v56 = vpop.f32.mrf.mxu0  ;;  %v2625_v60 = vpop.eup %2624 }
 0x241   : > { %v1703_v57 = vpop.f32.mrf.mxu1  ;;  %1900 = vst [vmem:[%s3348_s29 + $0x20] sm:$0xff] %v2346_v53  ;;  %1753 = vst [vmem:[%s3326_s11 + $0x88] sm:$0xff] %v1700_v54  ;;  %2638 = vtanh.f32 %v1700_v54  ;;  %v1702_v61 = vadd.f32 %v1701_v0, %v1589_v55  ;;  %v1591_v63 = vadd.f32 %v1590_v56, %v3320_v31 }
 0x242   : > { %v2627_v5 = vpop.eup %2626  ;;  %v1594_v6 = vpop.f32.mrf.mxu0 }
 0x243   : > { %v1707_v7 = vpop.f32.mrf.mxu1  ;;  %v2347_v8 = vpack.c.bf16 %v2627_v5, %v2625_v60  ;;  %1754 = vst [vmem:[%s3326_s11 + $0x90] sm:$0xff] %v1702_v61  ;;  %v1704_v9 = vadd.f32 %v1703_v57, %v1591_v63  ;;  %v1595_v10 = vadd.f32 %v1594_v6, %v3316_v4  ;;  %2640 = vtanh.f32 %v1702_v61 }
 0x244   : > { %v1596_v11 = vpop.f32.mrf.mxu0  ;;  %v2629_v13 = vpop.eup %2628 }
 0x245   : > { %v1709_v12 = vpop.f32.mrf.mxu1  ;;  %1901 = vst [vmem:[%s3348_s29 + $0x28] sm:$0xff] %v2347_v8  ;;  %1755 = vst [vmem:[%s3326_s11 + $0x98] sm:$0xff] %v1704_v9  ;;  %2642 = vtanh.f32 %v1704_v9  ;;  %v1708_v14 = vadd.f32 %v1707_v7, %v1595_v10  ;;  %v1597_v15 = vadd.f32 %v1596_v11, %v3320_v31 }
 0x246   : > { %v2631_v16 = vpop.eup %2630  ;;  %v1598_v17 = vpop.f32.mrf.mxu0 }
 0x247   : > { %v1711_v18 = vpop.f32.mrf.mxu1  ;;  %v2348_v19 = vpack.c.bf16 %v2631_v16, %v2629_v13  ;;  %1756 = vst [vmem:[%s3326_s11 + $0xa0] sm:$0xff] %v1708_v14  ;;  %v1710_v20 = vadd.f32 %v1709_v12, %v1597_v15  ;;  %v1599_v21 = vadd.f32 %v1598_v17, %v3316_v4  ;;  %2644 = vtanh.f32 %v1708_v14 }
 0x248   : > { %v1600_v22 = vpop.f32.mrf.mxu0  ;;  %v2633_v2 = vpop.eup %2632 }
 0x249   : > { %v1713_v1 = vpop.f32.mrf.mxu1  ;;  %1902 = vst [vmem:[%s3348_s29 + $0x30] sm:$0xff] %v2348_v19  ;;  %1757 = vst [vmem:[%s3326_s11 + $0xa8] sm:$0xff] %v1710_v20  ;;  %2646 = vtanh.f32 %v1710_v20  ;;  %v1712_v23 = vadd.f32 %v1711_v18, %v1599_v21  ;;  %v1601_v24 = vadd.f32 %v1600_v22, %v3320_v31 }
 0x24a   : > { %v2635_v25 = vpop.eup %2634  ;;  %v1604_v26 = vpop.f32.mrf.mxu0 }
 0x24b   : > { %v1717_v27 = vpop.f32.mrf.mxu1  ;;  %v2349_v28 = vpack.c.bf16 %v2635_v25, %v2633_v2  ;;  %1758 = vst [vmem:[%s3326_s11 + $0xb0] sm:$0xff] %v1712_v23  ;;  %v1714_v29 = vadd.f32 %v1713_v1, %v1601_v24  ;;  %v1605_v30 = vadd.f32 %v1604_v26, %v3316_v4  ;;  %2648 = vtanh.f32 %v1712_v23 }
 0x24c   : > { %v1606_v3 = vpop.f32.mrf.mxu0  ;;  %v2637_v33 = vpop.eup %2636 }
 0x24d   : > { %v1719_v32 = vpop.f32.mrf.mxu1  ;;  %1903 = vst [vmem:[%s3348_s29 + $0x38] sm:$0xff] %v2349_v28  ;;  %1759 = vst [vmem:[%s3326_s11 + $0xb8] sm:$0xff] %v1714_v29  ;;  %2650 = vtanh.f32 %v1714_v29  ;;  %v1718_v34 = vadd.f32 %v1717_v27, %v1605_v30  ;;  %v1607_v35 = vadd.f32 %v1606_v3, %v3320_v31 }
 0x24e   : > { %v2639_v36 = vpop.eup %2638  ;;  %v1608_v37 = vpop.f32.mrf.mxu0 }
 0x24f   : > { %v1721_v38 = vpop.f32.mrf.mxu1  ;;  %v2350_v39 = vpack.c.bf16 %v2639_v36, %v2637_v33  ;;  %1760 = vst [vmem:[%s3326_s11 + $0xc0] sm:$0xff] %v1718_v34  ;;  %v1720_v40 = vadd.f32 %v1719_v32, %v1607_v35  ;;  %v1609_v58 = vadd.f32 %v1608_v37, %v3316_v4  ;;  %2652 = vtanh.f32 %v1718_v34 }
 0x250   : > { %v1610_v59 = vpop.f32.mrf.mxu0  ;;  %v2641_v41 = vpop.eup %2640 }
 0x251   : > { %v1723_v62 = vpop.f32.mrf.mxu1  ;;  %1904 = vst [vmem:[%s3348_s29 + $0x40] sm:$0xff] %v2350_v39  ;;  %1761 = vst [vmem:[%s3326_s11 + $0xc8] sm:$0xff] %v1720_v40  ;;  %2654 = vtanh.f32 %v1720_v40  ;;  %v1722_v42 = vadd.f32 %v1721_v38, %v1609_v58  ;;  %v1611_v43 = vadd.f32 %v1610_v59, %v3320_v31 }
 0x252   : > { %v2643_v44 = vpop.eup %2642  ;;  %v1614_v45 = vpop.f32.mrf.mxu0 }
 0x253   : > { %v1727_v46 = vpop.f32.mrf.mxu1  ;;  %v2351_v47 = vpack.c.bf16 %v2643_v44, %v2641_v41  ;;  %1762 = vst [vmem:[%s3326_s11 + $0xd0] sm:$0xff] %v1722_v42  ;;  %v1724_v48 = vadd.f32 %v1723_v62, %v1611_v43  ;;  %v1615_v49 = vadd.f32 %v1614_v45, %v3316_v4  ;;  %2656 = vtanh.f32 %v1722_v42 }
 0x254   : > { %v1616_v50 = vpop.f32.mrf.mxu0  ;;  %v2645_v52 = vpop.eup %2644 }
 0x255   : > { %v1729_v51 = vpop.f32.mrf.mxu1  ;;  %1905 = vst [vmem:[%s3348_s29 + $0x48] sm:$0xff] %v2351_v47  ;;  %1763 = vst [vmem:[%s3326_s11 + $0xd8] sm:$0xff] %v1724_v48  ;;  %2658 = vtanh.f32 %v1724_v48  ;;  %v1728_v0 = vadd.f32 %v1727_v46, %v1615_v49  ;;  %v1617_v53 = vadd.f32 %v1616_v50, %v3320_v31 }
 0x256   : > { %v2647_v54 = vpop.eup %2646  ;;  %v1618_v55 = vpop.f32.mrf.mxu0 }
 0x257   : > { %v1731_v56 = vpop.f32.mrf.mxu1  ;;  %v2352_v57 = vpack.c.bf16 %v2647_v54, %v2645_v52  ;;  %1764 = vst [vmem:[%s3326_s11 + $0xe0] sm:$0xff] %v1728_v0  ;;  %v1730_v60 = vadd.f32 %v1729_v51, %v1617_v53  ;;  %v1619_v61 = vadd.f32 %v1618_v55, %v3316_v4  ;;  %2660 = vtanh.f32 %v1728_v0 }
 0x258   : > { %v1620_v63 = vpop.f32.mrf.mxu0  ;;  %v2649_v5 = vpop.eup %2648 }
 0x259   : > { %1906 = vst [vmem:[%s3348_s29 + $0x50] sm:$0xff] %v2352_v57  ;;  %1765 = vst [vmem:[%s3326_s11 + $0xe8] sm:$0xff] %v1730_v60  ;;  %2662 = vtanh.f32 %v1730_v60  ;;  %v1732_v6 = vadd.f32 %v1731_v56, %v1619_v61  ;;  %v1621_v7 = vadd.f32 %v1620_v63, %v3320_v31  ;;  %v1733_v9 = vpop.f32.mrf.mxu1 }
 0x25a   : > { %v2651_v8 = vpop.eup %2650 }
 0x25b   : > { %v2353_v10 = vpack.c.bf16 %v2651_v8, %v2649_v5  ;;  %1766 = vst [vmem:[%s3326_s11 + $0xf0] sm:$0xff] %v1732_v6  ;;  %v1734_v4 = vadd.f32 %v1733_v9, %v1621_v7  ;;  %2664 = vtanh.f32 %v1732_v6 }
 0x25c   : > { %v2653_v11 = vpop.eup %2652 }
 0x25d   : > { %1907 = vst [vmem:[%s3348_s29 + $0x58] sm:$0xff] %v2353_v10  ;;  %1767 = vst [vmem:[%s3326_s11 + $0xf8] sm:$0xff] %v1734_v4  ;;  %2666 = vtanh.f32 %v1734_v4 }
 0x25e   : > { %v2655_v31 = vpop.eup %2654 }
 0x25f   : > { %2813 = shalt.err (!%p2810_p1)
}
 0x260   : > { %s2814_s11 = scalar_lea.hbm %s3411_s30, 4096  ;;  %s2818_s22 = scalar_lea.hbm %s3503_s6, 8192 }
 0x261   : > { %p2815_p8 = scmp.ne.s32.totalorder %s3411_s30, %s2814_s11  ;;  %p2819_p13 = scmp.lt.s32.totalorder %s3411_s30, %s3503_s6 }
 0x262   : > { %p2820_p2 = scmp.lt.s32.totalorder %s2818_s22, %s2814_s11 }
 0x263   : > { %p2816_p10 = pnand %p2815_p8, %p3530_p6 }
 0x264   : > { %p2821_p4 = por %p2820_p2, %p2819_p13 }
 0x265   : > { %p2817_p11 = pneg %p2816_p10 }
 0x267   : > { %p2822_p12 = pnand %p2821_p4, %p2817_p11 }
 0x269   : > { %2825 = shalt.err (!%p2822_p12)
}
 0x26a   : > { %2379 = dma.vmem_to_hbm [thread:$0]  (%p3530_p6), %s3413_s1, 4096, %s3411_s30, %s3417_s15, %s2914_s23, %s2914_s23, %s2915_s10   ;;  %v2354_v12 = vpack.c.bf16 %v2655_v31, %v2653_v11  ;;  %v2657_v13 = vpop.eup %2656 }
 0x26b   : > { %v2659_v14 = vpop.eup %2658  ;;  %s2363_s19 = sshll.u32 %s2981_s28, 11  ;;  %s1971_s16 = sshll.u32 %s3348_s29, 4  ;;  %s3453_s16 = int_to_ptr.vmem [resolvable:$true] %s1971_s16 }
 0x26c   : > { %1908 = vst [vmem:[%s3348_s29 + $0x60] sm:$0xff] %v2354_v12  ;;  %v2355_v15 = vpack.c.bf16 %v2659_v14, %v2657_v13  ;;  %v2661_v16 = vpop.eup %2660  ;;  %s3451_s23 = scalar_lea.hbm %s3504_s7, %s2363_s19  ;;  %s2826_s10 = scalar_lea.vmem %s3453_s16, 2048 }
 0x26d   : > { %v2663_v17 = vpop.eup %2662  ;;  %p2827_p0 = scmp.ne.s32.totalorder %s3453_s16, %s2826_s10  ;;  %s2917_s28 = smov [#allocation13]  }
 0x26e   : > { %1909 = vst [vmem:[%s3348_s29 + $0x68] sm:$0xff] %v2355_v15  ;;  %v2356_v18 = vpack.c.bf16 %v2663_v17, %v2661_v16  ;;  %v2665_v19 = vpop.eup %2664  ;;  %s2830_s1 = sshll.u32 %s2917_s28, 4  ;;  %s2831_s1 = int_to_ptr.vmem [resolvable:$false] %s2830_s1 }
 0x26f   : > { %v2667_v20 = vpop.eup %2666  ;;  %p2828_p5 = pnand %p2827_p0, %p3530_p6  ;;  %s2832_s30 = scalar_lea.vmem %s2831_s1, 4096 }
 0x270   : > { %1910 = vst [vmem:[%s3348_s29 + $0x70] sm:$0xff] %v2356_v18  ;;  %v2357_v21 = vpack.c.bf16 %v2667_v20, %v2665_v19  ;;  %p2833_p7 = scmp.lt.s32.totalorder %s3453_s16, %s2831_s1  ;;  %p2834_p9 = scmp.lt.s32.totalorder %s2832_s30, %s2826_s10 }
 0x271   : > { %p2829_p3 = pneg %p2828_p5 }
 0x272   : > { %1911 = vst [vmem:[%s3348_s29 + $0x78] sm:$0xff] %v2357_v21  ;;  %p2835_p1 = por %p2834_p9, %p2833_p7 }
 0x274   : > { %p2836_p8 = pnand %p2835_p1, %p2829_p3 }
 0x276   : > { %2839 = shalt.err (!%p2836_p8)
}
 0x277   : > { %s2840_s14 = scalar_lea.hbm %s3451_s23, 2048  ;;  %s2844_s22 = scalar_lea.hbm %s3504_s7, 4096 }
 0x278   : > { %p2841_p10 = scmp.ne.s32.totalorder %s3451_s23, %s2840_s14  ;;  %p2845_p2 = scmp.lt.s32.totalorder %s3451_s23, %s3504_s7 }
 0x279   : > { %p2846_p4 = scmp.lt.s32.totalorder %s2844_s22, %s2840_s14 }
 0x27a   : > { %p2842_p11 = pnand %p2841_p10, %p3530_p6 }
 0x27b   : > { %p2847_p12 = por %p2846_p4, %p2845_p2 }
 0x27c   : > { %p2843_p13 = pneg %p2842_p11 }
 0x27e   : > { %p2848_p0 = pnand %p2847_p12, %p2843_p13 }
 0x280   : > { %2851 = shalt.err (!%p2848_p0)
}
 0x281   : > { %s2918_s19 = smov 128   ;;  %s2919_s9 = smov 8  }
 0x282   : > { %2380 = dma.vmem_to_hbm [thread:$0]  (%p3530_p6), %s3453_s16, 2048, %s3451_s23, %s3417_s15, %s2918_s19, %s2918_s19, %s2919_s9  }
 0x283 PF: > { %s1986_s11 = sand.u32 1, %s2890_s24   ;;  %p3532_p5 = scmp.ne.s32.totalorder %s3515_s8, 0 }
 0x284   : > { %p3533_p3 = scmp.ge.s32.totalorder %s2902_s27, 2  ;;  %s1987_s10 = scalar_lea.sflag [#allocation4], %s1986_s11 }
 0x286   : > { %p2399_p7 = pnand %p3533_p3, %p3532_p5 }
 0x288   : > { %p2400_p9 = pneg %p2399_p7 }
 0x28a   : > { %2881 = dma.done.wait (%p2400_p9), %s1987_s10, 4096  }
 0x28b   : > { %2883 = vsyncadd (%p2400_p9), %s1987_s10, 4294963200  ;;  %s3534_s28 = sadd.s32 4294967294, %s2902_s27  }
 0x28c   : > { %s1995_s1 = sand.u32 1, %s3534_s28  }
 0x28d   : > { %s1996_s30 = scalar_lea.sflag [#allocation12], %s1995_s1 }
 0x28e   : > { %2885 = dma.done.wait (%p2400_p9), %s1996_s30, 6144  }
 0x28f   : > { %2887 = vsyncadd (%p2400_p9), %s1996_s30, 4294961152  ;;  %p26_p6 = scmp.ge.s32.totalorder %s3045_s18, 4   ;;  %s3535_s24 = smov %s2894_s25 }
 0x290   : > { %s3536_s25 = smov %s2898_s26  ;;  %s3537_s26 = smov %s3055_s21 }
 0x291   : > { %s3538_s27 = smov %s3045_s18  ;;  %28 = sbr.rel (!%p26_p6) target bundleno = 11 (0xb), region = 129 }
 0x296   :  { %2010 = vsyncpa [#allocation3], 1 }
 0x297   :  { %2012 = vsyncpa [#allocation3 + $0x1], 1 }
 0x298   :  { %2013 = vsyncpa [#allocation6], 1 }
 0x299   :  { %2014 = vsyncpa [#allocation9], 1 }
 0x29a   :  { %2015 = vsyncpa [#allocation4], 1 }
 0x29b   :  { %2017 = vsyncpa [#allocation4 + $0x1], 1 }
 0x29c   :  { %2018 = vsyncpa [#allocation12], 1 }
 0x29d   :  { %2020 = vsyncpa [#allocation12 + $0x1], 1 }

</bundles_post_ra>
